<compile_context>
chip_gen: v7x
topology: tpu7x:2x2x1
jax: 0.10.0
libtpu: 0.0.40
codegen_flags: <defaults>
</compile_context>

<pallas_src>
import math

import jax
import jax.numpy as jnp
from jax.experimental import pallas as pl
from jax.experimental.pallas import tpu as pltpu


def _round_up(n, m):
    return ((n + m - 1) // m) * m


def make_gru_kernel(Bp, T, Hp, unroll):
    """Bp: sublane-padded batch, Hp: lane-padded per-gate / hidden width."""

    def kernel(x_ref,     # (T*Bp, D)   time-major, batch-padded input
               wx_ref,    # (D, 3*Hp)   fused x2h weight [r | i | n], lane-padded
               bx_ref,    # (1, 3*Hp)   x2h bias with bhr, bhi folded in
               wh_ref,    # (Hp, 3*Hp)  fused h2h weight (zero-padded)
               bhn_ref,   # (1, Hp)     h2h bias of the n gate (inside r*(..))
               wf_ref,    # (Hp, Op)    fc weight (zero-padded)
               bf_ref,    # (1, Op)     fc bias
               out_ref,   # (Bp, Op)    lane-dense output slab
               gx_ref):   # VMEM scratch (T*Bp, 3*Hp)
        # --- non-recurrent pass: x2h gates for ALL timesteps in one MXU matmul
        gx_ref[...] = (jnp.dot(x_ref[...], wx_ref[...],
                               preferred_element_type=jnp.float32)
                       + bx_ref[...])

        # Hoisted out of the recurrence: weights and the bias broadcast.
        # (Further option: keep wh resident in the MXU via matmul_push_rhs /
        #  matmul_acc_lhs; kept as plain jnp.dot here for portability.)
        wh = wh_ref[...]
        bhn = jnp.broadcast_to(bhn_ref[...], (Bp, Hp))

        def sigmoid(v):
            # logistic(v) == 0.5*tanh(0.5*v)+0.5 — keeps the transcendental
            # on the EUP slot; only adds/muls land on the VPU per step.
            return 0.5 * jnp.tanh(0.5 * v) + 0.5

        def step(t, h):
            # Sublane-aligned (Bp, 3*Hp) tile of the precomputed x2h gates.
            row = pl.multiple_of(t * Bp, Bp)
            g_x = gx_ref[pl.ds(row, Bp), :]
            # Single fused h2h matmul per step.
            g_h = jnp.dot(h, wh, preferred_element_type=jnp.float32)
            # 128-lane-aligned gate splits → whole-vreg reads.
            i_r, i_i, i_n = g_x[:, :Hp], g_x[:, Hp:2 * Hp], g_x[:, 2 * Hp:]
            h_r, h_i = g_h[:, :Hp], g_h[:, Hp:2 * Hp]
            h_n = g_h[:, 2 * Hp:] + bhn
            r = sigmoid(i_r + h_r)
            z = sigmoid(i_i + h_i)
            n = jnp.tanh(i_n + r * h_n)
            return n + z * (h - n)

        h_last = jax.lax.fori_loop(0, T, step,
                                   jnp.zeros((Bp, Hp), jnp.float32),
                                   unroll=unroll)

        # Final fc on the last hidden state (padded lanes of h are exactly 0).
        out_ref[...] = (jnp.dot(h_last, wf_ref[...],
                                preferred_element_type=jnp.float32)
                        + bf_ref[...])

    return kernel


def gru_model_forward(x, params):
    """x: (B, T, D) float32.  Returns (B, O) float32."""
    B, T, D = x.shape
    H, O = params["H"], params["O"]
    Hp = params["wh"].shape[0]        # lane-padded hidden / per-gate width
    Op = params["wf"].shape[1]        # lane-padded output width
    Bp = _round_up(B, 8)              # sublane-padded batch

    # Time-major + batch-pad + flatten: row t*Bp + b is timestep t of batch b,
    # so the hoisted x2h pass is one contiguous matmul and each recurrence
    # step reads an 8-sublane-aligned row block of gx.
    x_tm = jnp.transpose(x, (1, 0, 2))                    # (T, B, D)
    x_tm = jnp.pad(x_tm, ((0, 0), (0, Bp - B), (0, 0)))   # (T, Bp, D)
    x_flat = x_tm.reshape(T * Bp, D)

    args = (x_flat, params["wx"], params["bx"], params["wh"],
            params["bhn"], params["wf"], params["bf"])

    def full(a):
        nd = a.ndim
        return pl.BlockSpec(a.shape, lambda i: (0,) * nd)

    unroll = True if T <= 16 else 8   # cap unroll for long sequences

    out_pad = pl.pallas_call(
        make_gru_kernel(Bp, T, Hp, unroll),
        out_shape=jax.ShapeDtypeStruct((Bp, Op), jnp.float32),
        grid_spec=pltpu.PrefetchScalarGridSpec(
            num_scalar_prefetch=0,
            grid=(1,),                      # recurrence lives inside the kernel
            in_specs=[full(a) for a in args],
            out_specs=pl.BlockSpec((Bp, Op), lambda i: (0, 0)),
            scratch_shapes=[pltpu.VMEM((T * Bp, 3 * Hp), jnp.float32)],
        ),
        compiler_params=pltpu.CompilerParams(
            dimension_semantics=("arbitrary",)),
    )(*args)

    return out_pad[:B, :O]


def make_params(key, input_dim, hidden_dim, output_dim):
    """Init matching the PyTorch module's parameters, then fuse + pad for TPU.

    PyTorch shapes:
      x2h: Linear(D, 3H) -> weight (3H, D), bias (3H,)
      h2h: Linear(H, 3H) -> weight (3H, H), bias (3H,)
      fc : Linear(H, O)  -> weight (O, H),  bias (O,)
    GRUCell params ~ U(-1/sqrt(H), 1/sqrt(H)); fc uses the same bound here.
    """
    D, H, O = input_dim, hidden_dim, output_dim
    std = 1.0 / math.sqrt(H)
    ks = jax.random.split(key, 6)
    u = lambda k, shape: jax.random.uniform(k, shape, jnp.float32, -std, std)

    wx = u(ks[0], (3 * H, D))     # x2h.weight
    bx = u(ks[1], (3 * H,))       # x2h.bias
    wh = u(ks[2], (3 * H, H))     # h2h.weight
    bh = u(ks[3], (3 * H,))       # h2h.bias
    wf = u(ks[4], (O, H))         # fc.weight
    bf = u(ks[5], (O,))           # fc.bias

    Hp = _round_up(H, 128)        # per-gate / hidden lane-padded width
    Op = _round_up(O, 128)

    # Fused + 128-lane-padded forms. Gate g (order r|i|n, matching chunk(3,1))
    # occupies columns [g*Hp, g*Hp + H); padded rows/columns are zero so the
    # padded lanes of the hidden state stay exactly 0 through the recurrence.
    wx_p = jnp.zeros((D, 3 * Hp), jnp.float32)
    wh_p = jnp.zeros((Hp, 3 * Hp), jnp.float32)
    bx_p = jnp.zeros((1, 3 * Hp), jnp.float32)
    for g in range(3):
        wx_p = wx_p.at[:, g * Hp:g * Hp + H].set(wx[g * H:(g + 1) * H, :].T)
        wh_p = wh_p.at[:H, g * Hp:g * Hp + H].set(wh[g * H:(g + 1) * H, :].T)
        bg = bx[g * H:(g + 1) * H]
        if g < 2:                 # fold bhr / bhi into the x2h bias
            bg = bg + bh[g * H:(g + 1) * H]
        bx_p = bx_p.at[0, g * Hp:g * Hp + H].set(bg)
    bhn_p = jnp.zeros((1, Hp), jnp.float32).at[0, :H].set(bh[2 * H:])

    wf_p = jnp.zeros((Hp, Op), jnp.float32).at[:H, :O].set(wf.T)
    bf_p = jnp.zeros((1, Op), jnp.float32).at[0, :O].set(bf)

    params = dict(wx=wx_p, bx=bx_p, wh=wh_p, bhn=bhn_p, wf=wf_p, bf=bf_p,
                  H=H, O=O)
    raw = (wx, bx, wh, bh, wf, bf)
    return params, raw


def reference_forward(x, raw):
    """Pure-JAX replica of the PyTorch GRUModel forward (f32, HIGHEST dots)."""
    wx, bx, wh, bh, wf, bf = raw
    B, T, D = x.shape
    H = wh.shape[1]
    hp = jax.lax.Precision.HIGHEST
    h = jnp.zeros((B, H), jnp.float32)
    for t in range(T):
        xt = x[:, t, :]
        gx = jnp.dot(xt, wx.T, precision=hp) + bx
        gh = jnp.dot(h, wh.T, precision=hp) + bh
        i_r, i_i, i_n = gx[:, :H], gx[:, H:2 * H], gx[:, 2 * H:]
        h_r, h_i, h_n = gh[:, :H], gh[:, H:2 * H], gh[:, 2 * H:]
        r = jax.nn.sigmoid(i_r + h_r)
        z = jax.nn.sigmoid(i_i + h_i)
        n = jnp.tanh(i_n + r * h_n)
        h = n + z * (h - n)
    return jnp.dot(h, wf.T, precision=hp) + bf


if __name__ == "__main__":
    B, T, D, H, O = 2, 8, 16, 32, 8   # batch, seq, input_dim, hidden_dim, output_dim

    key = jax.random.PRNGKey(0)
    kx, kp = jax.random.split(key)
    x = jax.random.normal(kx, (B, T, D), jnp.float32)

    params, raw = make_params(kp, D, H, O)

    out = gru_model_forward(x, params)
    out = jax.block_until_ready(out)
    assert out.shape == (B, O)

    ref = reference_forward(x, raw)
    # 1e-4 tolerance documents the in-kernel MXU f32 (multi-pass bf16) matmul
    # path vs. the Precision.HIGHEST reference (per perf-review note).
    assert jnp.allclose(out, ref, atol=1e-4, rtol=1e-4), "mismatch vs reference"

    print("KERNEL_OK")
</pallas_src>

<mosaic_0001>
module attributes {stable_mosaic.version = 11 : i64} {
  func.func @kernel(%arg0: i32, %arg1: memref<64x16xf32, #tpu.memory_space<vmem>>, %arg2: memref<16x384xf32, #tpu.memory_space<vmem>>, %arg3: memref<1x384xf32, #tpu.memory_space<vmem>>, %arg4: memref<128x384xf32, #tpu.memory_space<vmem>>, %arg5: memref<1x128xf32, #tpu.memory_space<vmem>>, %arg6: memref<128x128xf32, #tpu.memory_space<vmem>>, %arg7: memref<1x128xf32, #tpu.memory_space<vmem>>, %arg8: memref<8x128xf32, #tpu.memory_space<vmem>>, %arg9: memref<64x384xf32, #tpu.memory_space<vmem>>) attributes {dimension_semantics = [#tpu.dimension_semantics<arbitrary>], iteration_bounds = array<i64: 1>, scalar_prefetch = 0 : i64, scratch_operands = 1 : i64, tpu.core_type = #tpu.core_type<tc>, window_params = [{pipeline_mode = #tpu.pipeline_mode<synchronous>, transform_indices = @transform_0, window_bounds = array<i64: 64, 16>}, {pipeline_mode = #tpu.pipeline_mode<synchronous>, transform_indices = @transform_1, window_bounds = array<i64: 16, 384>}, {pipeline_mode = #tpu.pipeline_mode<synchronous>, transform_indices = @transform_2, window_bounds = array<i64: 1, 384>}, {pipeline_mode = #tpu.pipeline_mode<synchronous>, transform_indices = @transform_3, window_bounds = array<i64: 128, 384>}, {pipeline_mode = #tpu.pipeline_mode<synchronous>, transform_indices = @transform_4, window_bounds = array<i64: 1, 128>}, {pipeline_mode = #tpu.pipeline_mode<synchronous>, transform_indices = @transform_5, window_bounds = array<i64: 128, 128>}, {pipeline_mode = #tpu.pipeline_mode<synchronous>, transform_indices = @transform_6, window_bounds = array<i64: 1, 128>}, {pipeline_mode = #tpu.pipeline_mode<synchronous>, transform_indices = @transform_7, window_bounds = array<i64: 8, 128>}]} {
    %c0 = arith.constant 0 : index
    %c0_0 = arith.constant 0 : index
    %0 = vector.load %arg1[%c0, %c0_0] : memref<64x16xf32, #tpu.memory_space<vmem>>, vector<64x16xf32>
    %c0_1 = arith.constant 0 : index
    %c0_2 = arith.constant 0 : index
    %1 = vector.load %arg2[%c0_1, %c0_2] : memref<16x384xf32, #tpu.memory_space<vmem>>, vector<16x384xf32>
    %cst = arith.constant dense<0.000000e+00> : vector<64x384xf32>
    %2 = tpu.matmul %0, %1, %cst {dimension_numbers = #tpu.dot_dimension_numbers<[1], [0], [0], [1], [0, 0, 1, 1], [], []>} : vector<64x16xf32>, vector<16x384xf32>, vector<64x384xf32> -> vector<64x384xf32>
    %c0_3 = arith.constant 0 : index
    %c0_4 = arith.constant 0 : index
    %3 = vector.load %arg3[%c0_3, %c0_4] : memref<1x384xf32, #tpu.memory_space<vmem>>, vector<1x384xf32>
    %4 = vector.broadcast %3 : vector<1x384xf32> to vector<64x384xf32>
    %5 = arith.addf %2, %4 : vector<64x384xf32>
    %c0_5 = arith.constant 0 : index
    %c0_6 = arith.constant 0 : index
    %6 = vector.load %arg9[%c0_5, %c0_6] : memref<64x384xf32, #tpu.memory_space<vmem>>, vector<64x384xf32>
    tpu.vector_store %arg9[%c0_5, %c0_6], %5 {strides = array<i32>} : memref<64x384xf32, #tpu.memory_space<vmem>>, vector<64x384xf32>,
    %c0_7 = arith.constant 0 : index
    %c0_8 = arith.constant 0 : index
    %7 = vector.load %arg4[%c0_7, %c0_8] : memref<128x384xf32, #tpu.memory_space<vmem>>, vector<128x384xf32>
    %c0_9 = arith.constant 0 : index
    %c0_10 = arith.constant 0 : index
    %8 = vector.load %arg5[%c0_9, %c0_10] : memref<1x128xf32, #tpu.memory_space<vmem>>, vector<1x128xf32>
    %9 = vector.shape_cast %8 : vector<1x128xf32> to vector<1x128xf32>
    %10 = vector.broadcast %9 : vector<1x128xf32> to vector<8x128xf32>
    %cst_11 = arith.constant 0.000000e+00 : f32
    %11 = vector.broadcast %cst_11 : f32 to vector<8x128xf32>
    %c0_i32 = arith.constant 0 : i32
    %c8_i32 = arith.constant 8 : i32
    %12 = arith.muli %c0_i32, %c8_i32 : i32
    %13 = tpu.assume_multiple %12, 8 : i32
    %14 = arith.index_cast %13 : i32 to index
    %c0_12 = arith.constant 0 : index
    %15 = vector.load %arg9[%14, %c0_12] : memref<64x384xf32, #tpu.memory_space<vmem>>, vector<8x384xf32>
    %cst_13 = arith.constant dense<0.000000e+00> : vector<8x384xf32>
    %16 = tpu.matmul %11, %7, %cst_13 {dimension_numbers = #tpu.dot_dimension_numbers<[1], [0], [0], [1], [0, 0, 1, 1], [], []>} : vector<8x128xf32>, vector<128x384xf32>, vector<8x384xf32> -> vector<8x384xf32>
    %17 = vector.extract_strided_slice %15 {offsets = [0, 0], sizes = [8, 128], strides = [1, 1]} : vector<8x384xf32> to vector<8x128xf32>
    %18 = vector.extract_strided_slice %15 {offsets = [0, 128], sizes = [8, 128], strides = [1, 1]} : vector<8x384xf32> to vector<8x128xf32>
    %19 = vector.extract_strided_slice %15 {offsets = [0, 256], sizes = [8, 128], strides = [1, 1]} : vector<8x384xf32> to vector<8x128xf32>
    %20 = vector.extract_strided_slice %16 {offsets = [0, 0], sizes = [8, 128], strides = [1, 1]} : vector<8x384xf32> to vector<8x128xf32>
    %21 = vector.extract_strided_slice %16 {offsets = [0, 128], sizes = [8, 128], strides = [1, 1]} : vector<8x384xf32> to vector<8x128xf32>
    %22 = vector.extract_strided_slice %16 {offsets = [0, 256], sizes = [8, 128], strides = [1, 1]} : vector<8x384xf32> to vector<8x128xf32>
    %23 = arith.addf %22, %10 : vector<8x128xf32>
    %24 = arith.addf %17, %20 : vector<8x128xf32>
    %cst_14 = arith.constant 5.000000e-01 : f32
    %25 = vector.broadcast %cst_14 : f32 to vector<8x128xf32>
    %26 = arith.mulf %25, %24 : vector<8x128xf32>
    %27 = math.tanh %26 : vector<8x128xf32>
    %cst_15 = arith.constant 5.000000e-01 : f32
    %28 = vector.broadcast %cst_15 : f32 to vector<8x128xf32>
    %29 = arith.mulf %28, %27 : vector<8x128xf32>
    %cst_16 = arith.constant 5.000000e-01 : f32
    %30 = vector.broadcast %cst_16 : f32 to vector<8x128xf32>
    %31 = arith.addf %29, %30 : vector<8x128xf32>
    %32 = arith.addf %18, %21 : vector<8x128xf32>
    %cst_17 = arith.constant 5.000000e-01 : f32
    %33 = vector.broadcast %cst_17 : f32 to vector<8x128xf32>
    %34 = arith.mulf %33, %32 : vector<8x128xf32>
    %35 = math.tanh %34 : vector<8x128xf32>
    %cst_18 = arith.constant 5.000000e-01 : f32
    %36 = vector.broadcast %cst_18 : f32 to vector<8x128xf32>
    %37 = arith.mulf %36, %35 : vector<8x128xf32>
    %cst_19 = arith.constant 5.000000e-01 : f32
    %38 = vector.broadcast %cst_19 : f32 to vector<8x128xf32>
    %39 = arith.addf %37, %38 : vector<8x128xf32>
    %40 = arith.mulf %31, %23 : vector<8x128xf32>
    %41 = arith.addf %19, %40 : vector<8x128xf32>
    %42 = math.tanh %41 : vector<8x128xf32>
    %43 = arith.subf %11, %42 : vector<8x128xf32>
    %44 = arith.mulf %39, %43 : vector<8x128xf32>
    %45 = arith.addf %42, %44 : vector<8x128xf32>
    %c1_i32 = arith.constant 1 : i32
    %c8_i32_20 = arith.constant 8 : i32
    %46 = arith.muli %c1_i32, %c8_i32_20 : i32
    %47 = tpu.assume_multiple %46, 8 : i32
    %48 = arith.index_cast %47 : i32 to index
    %c0_21 = arith.constant 0 : index
    %49 = vector.load %arg9[%48, %c0_21] : memref<64x384xf32, #tpu.memory_space<vmem>>, vector<8x384xf32>
    %cst_22 = arith.constant dense<0.000000e+00> : vector<8x384xf32>
    %50 = tpu.matmul %45, %7, %cst_22 {dimension_numbers = #tpu.dot_dimension_numbers<[1], [0], [0], [1], [0, 0, 1, 1], [], []>} : vector<8x128xf32>, vector<128x384xf32>, vector<8x384xf32> -> vector<8x384xf32>
    %51 = vector.extract_strided_slice %49 {offsets = [0, 0], sizes = [8, 128], strides = [1, 1]} : vector<8x384xf32> to vector<8x128xf32>
    %52 = vector.extract_strided_slice %49 {offsets = [0, 128], sizes = [8, 128], strides = [1, 1]} : vector<8x384xf32> to vector<8x128xf32>
    %53 = vector.extract_strided_slice %49 {offsets = [0, 256], sizes = [8, 128], strides = [1, 1]} : vector<8x384xf32> to vector<8x128xf32>
    %54 = vector.extract_strided_slice %50 {offsets = [0, 0], sizes = [8, 128], strides = [1, 1]} : vector<8x384xf32> to vector<8x128xf32>
    %55 = vector.extract_strided_slice %50 {offsets = [0, 128], sizes = [8, 128], strides = [1, 1]} : vector<8x384xf32> to vector<8x128xf32>
    %56 = vector.extract_strided_slice %50 {offsets = [0, 256], sizes = [8, 128], strides = [1, 1]} : vector<8x384xf32> to vector<8x128xf32>
    %57 = arith.addf %56, %10 : vector<8x128xf32>
    %58 = arith.addf %51, %54 : vector<8x128xf32>
    %cst_23 = arith.constant 5.000000e-01 : f32
    %59 = vector.broadcast %cst_23 : f32 to vector<8x128xf32>
    %60 = arith.mulf %59, %58 : vector<8x128xf32>
    %61 = math.tanh %60 : vector<8x128xf32>
    %cst_24 = arith.constant 5.000000e-01 : f32
    %62 = vector.broadcast %cst_24 : f32 to vector<8x128xf32>
    %63 = arith.mulf %62, %61 : vector<8x128xf32>
    %cst_25 = arith.constant 5.000000e-01 : f32
    %64 = vector.broadcast %cst_25 : f32 to vector<8x128xf32>
    %65 = arith.addf %63, %64 : vector<8x128xf32>
    %66 = arith.addf %52, %55 : vector<8x128xf32>
    %cst_26 = arith.constant 5.000000e-01 : f32
    %67 = vector.broadcast %cst_26 : f32 to vector<8x128xf32>
    %68 = arith.mulf %67, %66 : vector<8x128xf32>
    %69 = math.tanh %68 : vector<8x128xf32>
    %cst_27 = arith.constant 5.000000e-01 : f32
    %70 = vector.broadcast %cst_27 : f32 to vector<8x128xf32>
    %71 = arith.mulf %70, %69 : vector<8x128xf32>
    %cst_28 = arith.constant 5.000000e-01 : f32
    %72 = vector.broadcast %cst_28 : f32 to vector<8x128xf32>
    %73 = arith.addf %71, %72 : vector<8x128xf32>
    %74 = arith.mulf %65, %57 : vector<8x128xf32>
    %75 = arith.addf %53, %74 : vector<8x128xf32>
    %76 = math.tanh %75 : vector<8x128xf32>
    %77 = arith.subf %45, %76 : vector<8x128xf32>
    %78 = arith.mulf %73, %77 : vector<8x128xf32>
    %79 = arith.addf %76, %78 : vector<8x128xf32>
    %c2_i32 = arith.constant 2 : i32
    %c8_i32_29 = arith.constant 8 : i32
    %80 = arith.muli %c2_i32, %c8_i32_29 : i32
    %81 = tpu.assume_multiple %80, 8 : i32
    %82 = arith.index_cast %81 : i32 to index
    %c0_30 = arith.constant 0 : index
    %83 = vector.load %arg9[%82, %c0_30] : memref<64x384xf32, #tpu.memory_space<vmem>>, vector<8x384xf32>
    %cst_31 = arith.constant dense<0.000000e+00> : vector<8x384xf32>
    %84 = tpu.matmul %79, %7, %cst_31 {dimension_numbers = #tpu.dot_dimension_numbers<[1], [0], [0], [1], [0, 0, 1, 1], [], []>} : vector<8x128xf32>, vector<128x384xf32>, vector<8x384xf32> -> vector<8x384xf32>
    %85 = vector.extract_strided_slice %83 {offsets = [0, 0], sizes = [8, 128], strides = [1, 1]} : vector<8x384xf32> to vector<8x128xf32>
    %86 = vector.extract_strided_slice %83 {offsets = [0, 128], sizes = [8, 128], strides = [1, 1]} : vector<8x384xf32> to vector<8x128xf32>
    %87 = vector.extract_strided_slice %83 {offsets = [0, 256], sizes = [8, 128], strides = [1, 1]} : vector<8x384xf32> to vector<8x128xf32>
    %88 = vector.extract_strided_slice %84 {offsets = [0, 0], sizes = [8, 128], strides = [1, 1]} : vector<8x384xf32> to vector<8x128xf32>
    %89 = vector.extract_strided_slice %84 {offsets = [0, 128], sizes = [8, 128], strides = [1, 1]} : vector<8x384xf32> to vector<8x128xf32>
    %90 = vector.extract_strided_slice %84 {offsets = [0, 256], sizes = [8, 128], strides = [1, 1]} : vector<8x384xf32> to vector<8x128xf32>
    %91 = arith.addf %90, %10 : vector<8x128xf32>
    %92 = arith.addf %85, %88 : vector<8x128xf32>
    %cst_32 = arith.constant 5.000000e-01 : f32
    %93 = vector.broadcast %cst_32 : f32 to vector<8x128xf32>
    %94 = arith.mulf %93, %92 : vector<8x128xf32>
    %95 = math.tanh %94 : vector<8x128xf32>
    %cst_33 = arith.constant 5.000000e-01 : f32
    %96 = vector.broadcast %cst_33 : f32 to vector<8x128xf32>
    %97 = arith.mulf %96, %95 : vector<8x128xf32>
    %cst_34 = arith.constant 5.000000e-01 : f32
    %98 = vector.broadcast %cst_34 : f32 to vector<8x128xf32>
    %99 = arith.addf %97, %98 : vector<8x128xf32>
    %100 = arith.addf %86, %89 : vector<8x128xf32>
    %cst_35 = arith.constant 5.000000e-01 : f32
    %101 = vector.broadcast %cst_35 : f32 to vector<8x128xf32>
    %102 = arith.mulf %101, %100 : vector<8x128xf32>
    %103 = math.tanh %102 : vector<8x128xf32>
    %cst_36 = arith.constant 5.000000e-01 : f32
    %104 = vector.broadcast %cst_36 : f32 to vector<8x128xf32>
    %105 = arith.mulf %104, %103 : vector<8x128xf32>
    %cst_37 = arith.constant 5.000000e-01 : f32
    %106 = vector.broadcast %cst_37 : f32 to vector<8x128xf32>
    %107 = arith.addf %105, %106 : vector<8x128xf32>
    %108 = arith.mulf %99, %91 : vector<8x128xf32>
    %109 = arith.addf %87, %108 : vector<8x128xf32>
    %110 = math.tanh %109 : vector<8x128xf32>
    %111 = arith.subf %79, %110 : vector<8x128xf32>
    %112 = arith.mulf %107, %111 : vector<8x128xf32>
    %113 = arith.addf %110, %112 : vector<8x128xf32>
    %c3_i32 = arith.constant 3 : i32
    %c8_i32_38 = arith.constant 8 : i32
    %114 = arith.muli %c3_i32, %c8_i32_38 : i32
    %115 = tpu.assume_multiple %114, 8 : i32
    %116 = arith.index_cast %115 : i32 to index
    %c0_39 = arith.constant 0 : index
    %117 = vector.load %arg9[%116, %c0_39] : memref<64x384xf32, #tpu.memory_space<vmem>>, vector<8x384xf32>
    %cst_40 = arith.constant dense<0.000000e+00> : vector<8x384xf32>
    %118 = tpu.matmul %113, %7, %cst_40 {dimension_numbers = #tpu.dot_dimension_numbers<[1], [0], [0], [1], [0, 0, 1, 1], [], []>} : vector<8x128xf32>, vector<128x384xf32>, vector<8x384xf32> -> vector<8x384xf32>
    %119 = vector.extract_strided_slice %117 {offsets = [0, 0], sizes = [8, 128], strides = [1, 1]} : vector<8x384xf32> to vector<8x128xf32>
    %120 = vector.extract_strided_slice %117 {offsets = [0, 128], sizes = [8, 128], strides = [1, 1]} : vector<8x384xf32> to vector<8x128xf32>
    %121 = vector.extract_strided_slice %117 {offsets = [0, 256], sizes = [8, 128], strides = [1, 1]} : vector<8x384xf32> to vector<8x128xf32>
    %122 = vector.extract_strided_slice %118 {offsets = [0, 0], sizes = [8, 128], strides = [1, 1]} : vector<8x384xf32> to vector<8x128xf32>
    %123 = vector.extract_strided_slice %118 {offsets = [0, 128], sizes = [8, 128], strides = [1, 1]} : vector<8x384xf32> to vector<8x128xf32>
    %124 = vector.extract_strided_slice %118 {offsets = [0, 256], sizes = [8, 128], strides = [1, 1]} : vector<8x384xf32> to vector<8x128xf32>
    %125 = arith.addf %124, %10 : vector<8x128xf32>
    %126 = arith.addf %119, %122 : vector<8x128xf32>
    %cst_41 = arith.constant 5.000000e-01 : f32
    %127 = vector.broadcast %cst_41 : f32 to vector<8x128xf32>
    %128 = arith.mulf %127, %126 : vector<8x128xf32>
    %129 = math.tanh %128 : vector<8x128xf32>
    %cst_42 = arith.constant 5.000000e-01 : f32
    %130 = vector.broadcast %cst_42 : f32 to vector<8x128xf32>
    %131 = arith.mulf %130, %129 : vector<8x128xf32>
    %cst_43 = arith.constant 5.000000e-01 : f32
    %132 = vector.broadcast %cst_43 : f32 to vector<8x128xf32>
    %133 = arith.addf %131, %132 : vector<8x128xf32>
    %134 = arith.addf %120, %123 : vector<8x128xf32>
    %cst_44 = arith.constant 5.000000e-01 : f32
    %135 = vector.broadcast %cst_44 : f32 to vector<8x128xf32>
    %136 = arith.mulf %135, %134 : vector<8x128xf32>
    %137 = math.tanh %136 : vector<8x128xf32>
    %cst_45 = arith.constant 5.000000e-01 : f32
    %138 = vector.broadcast %cst_45 : f32 to vector<8x128xf32>
    %139 = arith.mulf %138, %137 : vector<8x128xf32>
    %cst_46 = arith.constant 5.000000e-01 : f32
    %140 = vector.broadcast %cst_46 : f32 to vector<8x128xf32>
    %141 = arith.addf %139, %140 : vector<8x128xf32>
    %142 = arith.mulf %133, %125 : vector<8x128xf32>
    %143 = arith.addf %121, %142 : vector<8x128xf32>
    %144 = math.tanh %143 : vector<8x128xf32>
    %145 = arith.subf %113, %144 : vector<8x128xf32>
    %146 = arith.mulf %141, %145 : vector<8x128xf32>
    %147 = arith.addf %144, %146 : vector<8x128xf32>
    %c4_i32 = arith.constant 4 : i32
    %c8_i32_47 = arith.constant 8 : i32
    %148 = arith.muli %c4_i32, %c8_i32_47 : i32
    %149 = tpu.assume_multiple %148, 8 : i32
    %150 = arith.index_cast %149 : i32 to index
    %c0_48 = arith.constant 0 : index
    %151 = vector.load %arg9[%150, %c0_48] : memref<64x384xf32, #tpu.memory_space<vmem>>, vector<8x384xf32>
    %cst_49 = arith.constant dense<0.000000e+00> : vector<8x384xf32>
    %152 = tpu.matmul %147, %7, %cst_49 {dimension_numbers = #tpu.dot_dimension_numbers<[1], [0], [0], [1], [0, 0, 1, 1], [], []>} : vector<8x128xf32>, vector<128x384xf32>, vector<8x384xf32> -> vector<8x384xf32>
    %153 = vector.extract_strided_slice %151 {offsets = [0, 0], sizes = [8, 128], strides = [1, 1]} : vector<8x384xf32> to vector<8x128xf32>
    %154 = vector.extract_strided_slice %151 {offsets = [0, 128], sizes = [8, 128], strides = [1, 1]} : vector<8x384xf32> to vector<8x128xf32>
    %155 = vector.extract_strided_slice %151 {offsets = [0, 256], sizes = [8, 128], strides = [1, 1]} : vector<8x384xf32> to vector<8x128xf32>
    %156 = vector.extract_strided_slice %152 {offsets = [0, 0], sizes = [8, 128], strides = [1, 1]} : vector<8x384xf32> to vector<8x128xf32>
    %157 = vector.extract_strided_slice %152 {offsets = [0, 128], sizes = [8, 128], strides = [1, 1]} : vector<8x384xf32> to vector<8x128xf32>
    %158 = vector.extract_strided_slice %152 {offsets = [0, 256], sizes = [8, 128], strides = [1, 1]} : vector<8x384xf32> to vector<8x128xf32>
    %159 = arith.addf %158, %10 : vector<8x128xf32>
    %160 = arith.addf %153, %156 : vector<8x128xf32>
    %cst_50 = arith.constant 5.000000e-01 : f32
    %161 = vector.broadcast %cst_50 : f32 to vector<8x128xf32>
    %162 = arith.mulf %161, %160 : vector<8x128xf32>
    %163 = math.tanh %162 : vector<8x128xf32>
    %cst_51 = arith.constant 5.000000e-01 : f32
    %164 = vector.broadcast %cst_51 : f32 to vector<8x128xf32>
    %165 = arith.mulf %164, %163 : vector<8x128xf32>
    %cst_52 = arith.constant 5.000000e-01 : f32
    %166 = vector.broadcast %cst_52 : f32 to vector<8x128xf32>
    %167 = arith.addf %165, %166 : vector<8x128xf32>
    %168 = arith.addf %154, %157 : vector<8x128xf32>
    %cst_53 = arith.constant 5.000000e-01 : f32
    %169 = vector.broadcast %cst_53 : f32 to vector<8x128xf32>
    %170 = arith.mulf %169, %168 : vector<8x128xf32>
    %171 = math.tanh %170 : vector<8x128xf32>
    %cst_54 = arith.constant 5.000000e-01 : f32
    %172 = vector.broadcast %cst_54 : f32 to vector<8x128xf32>
    %173 = arith.mulf %172, %171 : vector<8x128xf32>
    %cst_55 = arith.constant 5.000000e-01 : f32
    %174 = vector.broadcast %cst_55 : f32 to vector<8x128xf32>
    %175 = arith.addf %173, %174 : vector<8x128xf32>
    %176 = arith.mulf %167, %159 : vector<8x128xf32>
    %177 = arith.addf %155, %176 : vector<8x128xf32>
    %178 = math.tanh %177 : vector<8x128xf32>
    %179 = arith.subf %147, %178 : vector<8x128xf32>
    %180 = arith.mulf %175, %179 : vector<8x128xf32>
    %181 = arith.addf %178, %180 : vector<8x128xf32>
    %c5_i32 = arith.constant 5 : i32
    %c8_i32_56 = arith.constant 8 : i32
    %182 = arith.muli %c5_i32, %c8_i32_56 : i32
    %183 = tpu.assume_multiple %182, 8 : i32
    %184 = arith.index_cast %183 : i32 to index
    %c0_57 = arith.constant 0 : index
    %185 = vector.load %arg9[%184, %c0_57] : memref<64x384xf32, #tpu.memory_space<vmem>>, vector<8x384xf32>
    %cst_58 = arith.constant dense<0.000000e+00> : vector<8x384xf32>
    %186 = tpu.matmul %181, %7, %cst_58 {dimension_numbers = #tpu.dot_dimension_numbers<[1], [0], [0], [1], [0, 0, 1, 1], [], []>} : vector<8x128xf32>, vector<128x384xf32>, vector<8x384xf32> -> vector<8x384xf32>
    %187 = vector.extract_strided_slice %185 {offsets = [0, 0], sizes = [8, 128], strides = [1, 1]} : vector<8x384xf32> to vector<8x128xf32>
    %188 = vector.extract_strided_slice %185 {offsets = [0, 128], sizes = [8, 128], strides = [1, 1]} : vector<8x384xf32> to vector<8x128xf32>
    %189 = vector.extract_strided_slice %185 {offsets = [0, 256], sizes = [8, 128], strides = [1, 1]} : vector<8x384xf32> to vector<8x128xf32>
    %190 = vector.extract_strided_slice %186 {offsets = [0, 0], sizes = [8, 128], strides = [1, 1]} : vector<8x384xf32> to vector<8x128xf32>
    %191 = vector.extract_strided_slice %186 {offsets = [0, 128], sizes = [8, 128], strides = [1, 1]} : vector<8x384xf32> to vector<8x128xf32>
    %192 = vector.extract_strided_slice %186 {offsets = [0, 256], sizes = [8, 128], strides = [1, 1]} : vector<8x384xf32> to vector<8x128xf32>
    %193 = arith.addf %192, %10 : vector<8x128xf32>
    %194 = arith.addf %187, %190 : vector<8x128xf32>
    %cst_59 = arith.constant 5.000000e-01 : f32
    %195 = vector.broadcast %cst_59 : f32 to vector<8x128xf32>
    %196 = arith.mulf %195, %194 : vector<8x128xf32>
    %197 = math.tanh %196 : vector<8x128xf32>
    %cst_60 = arith.constant 5.000000e-01 : f32
    %198 = vector.broadcast %cst_60 : f32 to vector<8x128xf32>
    %199 = arith.mulf %198, %197 : vector<8x128xf32>
    %cst_61 = arith.constant 5.000000e-01 : f32
    %200 = vector.broadcast %cst_61 : f32 to vector<8x128xf32>
    %201 = arith.addf %199, %200 : vector<8x128xf32>
    %202 = arith.addf %188, %191 : vector<8x128xf32>
    %cst_62 = arith.constant 5.000000e-01 : f32
    %203 = vector.broadcast %cst_62 : f32 to vector<8x128xf32>
    %204 = arith.mulf %203, %202 : vector<8x128xf32>
    %205 = math.tanh %204 : vector<8x128xf32>
    %cst_63 = arith.constant 5.000000e-01 : f32
    %206 = vector.broadcast %cst_63 : f32 to vector<8x128xf32>
    %207 = arith.mulf %206, %205 : vector<8x128xf32>
    %cst_64 = arith.constant 5.000000e-01 : f32
    %208 = vector.broadcast %cst_64 : f32 to vector<8x128xf32>
    %209 = arith.addf %207, %208 : vector<8x128xf32>
    %210 = arith.mulf %201, %193 : vector<8x128xf32>
    %211 = arith.addf %189, %210 : vector<8x128xf32>
    %212 = math.tanh %211 : vector<8x128xf32>
    %213 = arith.subf %181, %212 : vector<8x128xf32>
    %214 = arith.mulf %209, %213 : vector<8x128xf32>
    %215 = arith.addf %212, %214 : vector<8x128xf32>
    %c6_i32 = arith.constant 6 : i32
    %c8_i32_65 = arith.constant 8 : i32
    %216 = arith.muli %c6_i32, %c8_i32_65 : i32
    %217 = tpu.assume_multiple %216, 8 : i32
    %218 = arith.index_cast %217 : i32 to index
    %c0_66 = arith.constant 0 : index
    %219 = vector.load %arg9[%218, %c0_66] : memref<64x384xf32, #tpu.memory_space<vmem>>, vector<8x384xf32>
    %cst_67 = arith.constant dense<0.000000e+00> : vector<8x384xf32>
    %220 = tpu.matmul %215, %7, %cst_67 {dimension_numbers = #tpu.dot_dimension_numbers<[1], [0], [0], [1], [0, 0, 1, 1], [], []>} : vector<8x128xf32>, vector<128x384xf32>, vector<8x384xf32> -> vector<8x384xf32>
    %221 = vector.extract_strided_slice %219 {offsets = [0, 0], sizes = [8, 128], strides = [1, 1]} : vector<8x384xf32> to vector<8x128xf32>
    %222 = vector.extract_strided_slice %219 {offsets = [0, 128], sizes = [8, 128], strides = [1, 1]} : vector<8x384xf32> to vector<8x128xf32>
    %223 = vector.extract_strided_slice %219 {offsets = [0, 256], sizes = [8, 128], strides = [1, 1]} : vector<8x384xf32> to vector<8x128xf32>
    %224 = vector.extract_strided_slice %220 {offsets = [0, 0], sizes = [8, 128], strides = [1, 1]} : vector<8x384xf32> to vector<8x128xf32>
    %225 = vector.extract_strided_slice %220 {offsets = [0, 128], sizes = [8, 128], strides = [1, 1]} : vector<8x384xf32> to vector<8x128xf32>
    %226 = vector.extract_strided_slice %220 {offsets = [0, 256], sizes = [8, 128], strides = [1, 1]} : vector<8x384xf32> to vector<8x128xf32>
    %227 = arith.addf %226, %10 : vector<8x128xf32>
    %228 = arith.addf %221, %224 : vector<8x128xf32>
    %cst_68 = arith.constant 5.000000e-01 : f32
    %229 = vector.broadcast %cst_68 : f32 to vector<8x128xf32>
    %230 = arith.mulf %229, %228 : vector<8x128xf32>
    %231 = math.tanh %230 : vector<8x128xf32>
    %cst_69 = arith.constant 5.000000e-01 : f32
    %232 = vector.broadcast %cst_69 : f32 to vector<8x128xf32>
    %233 = arith.mulf %232, %231 : vector<8x128xf32>
    %cst_70 = arith.constant 5.000000e-01 : f32
    %234 = vector.broadcast %cst_70 : f32 to vector<8x128xf32>
    %235 = arith.addf %233, %234 : vector<8x128xf32>
    %236 = arith.addf %222, %225 : vector<8x128xf32>
    %cst_71 = arith.constant 5.000000e-01 : f32
    %237 = vector.broadcast %cst_71 : f32 to vector<8x128xf32>
    %238 = arith.mulf %237, %236 : vector<8x128xf32>
    %239 = math.tanh %238 : vector<8x128xf32>
    %cst_72 = arith.constant 5.000000e-01 : f32
    %240 = vector.broadcast %cst_72 : f32 to vector<8x128xf32>
    %241 = arith.mulf %240, %239 : vector<8x128xf32>
    %cst_73 = arith.constant 5.000000e-01 : f32
    %242 = vector.broadcast %cst_73 : f32 to vector<8x128xf32>
    %243 = arith.addf %241, %242 : vector<8x128xf32>
    %244 = arith.mulf %235, %227 : vector<8x128xf32>
    %245 = arith.addf %223, %244 : vector<8x128xf32>
    %246 = math.tanh %245 : vector<8x128xf32>
    %247 = arith.subf %215, %246 : vector<8x128xf32>
    %248 = arith.mulf %243, %247 : vector<8x128xf32>
    %249 = arith.addf %246, %248 : vector<8x128xf32>
    %c7_i32 = arith.constant 7 : i32
    %c8_i32_74 = arith.constant 8 : i32
    %250 = arith.muli %c7_i32, %c8_i32_74 : i32
    %251 = tpu.assume_multiple %250, 8 : i32
    %252 = arith.index_cast %251 : i32 to index
    %c0_75 = arith.constant 0 : index
    %253 = vector.load %arg9[%252, %c0_75] : memref<64x384xf32, #tpu.memory_space<vmem>>, vector<8x384xf32>
    %cst_76 = arith.constant dense<0.000000e+00> : vector<8x384xf32>
    %254 = tpu.matmul %249, %7, %cst_76 {dimension_numbers = #tpu.dot_dimension_numbers<[1], [0], [0], [1], [0, 0, 1, 1], [], []>} : vector<8x128xf32>, vector<128x384xf32>, vector<8x384xf32> -> vector<8x384xf32>
    %255 = vector.extract_strided_slice %253 {offsets = [0, 0], sizes = [8, 128], strides = [1, 1]} : vector<8x384xf32> to vector<8x128xf32>
    %256 = vector.extract_strided_slice %253 {offsets = [0, 128], sizes = [8, 128], strides = [1, 1]} : vector<8x384xf32> to vector<8x128xf32>
    %257 = vector.extract_strided_slice %253 {offsets = [0, 256], sizes = [8, 128], strides = [1, 1]} : vector<8x384xf32> to vector<8x128xf32>
    %258 = vector.extract_strided_slice %254 {offsets = [0, 0], sizes = [8, 128], strides = [1, 1]} : vector<8x384xf32> to vector<8x128xf32>
    %259 = vector.extract_strided_slice %254 {offsets = [0, 128], sizes = [8, 128], strides = [1, 1]} : vector<8x384xf32> to vector<8x128xf32>
    %260 = vector.extract_strided_slice %254 {offsets = [0, 256], sizes = [8, 128], strides = [1, 1]} : vector<8x384xf32> to vector<8x128xf32>
    %261 = arith.addf %260, %10 : vector<8x128xf32>
    %262 = arith.addf %255, %258 : vector<8x128xf32>
    %cst_77 = arith.constant 5.000000e-01 : f32
    %263 = vector.broadcast %cst_77 : f32 to vector<8x128xf32>
    %264 = arith.mulf %263, %262 : vector<8x128xf32>
    %265 = math.tanh %264 : vector<8x128xf32>
    %cst_78 = arith.constant 5.000000e-01 : f32
    %266 = vector.broadcast %cst_78 : f32 to vector<8x128xf32>
    %267 = arith.mulf %266, %265 : vector<8x128xf32>
    %cst_79 = arith.constant 5.000000e-01 : f32
    %268 = vector.broadcast %cst_79 : f32 to vector<8x128xf32>
    %269 = arith.addf %267, %268 : vector<8x128xf32>
    %270 = arith.addf %256, %259 : vector<8x128xf32>
    %cst_80 = arith.constant 5.000000e-01 : f32
    %271 = vector.broadcast %cst_80 : f32 to vector<8x128xf32>
    %272 = arith.mulf %271, %270 : vector<8x128xf32>
    %273 = math.tanh %272 : vector<8x128xf32>
    %cst_81 = arith.constant 5.000000e-01 : f32
    %274 = vector.broadcast %cst_81 : f32 to vector<8x128xf32>
    %275 = arith.mulf %274, %273 : vector<8x128xf32>
    %cst_82 = arith.constant 5.000000e-01 : f32
    %276 = vector.broadcast %cst_82 : f32 to vector<8x128xf32>
    %277 = arith.addf %275, %276 : vector<8x128xf32>
    %278 = arith.mulf %269, %261 : vector<8x128xf32>
    %279 = arith.addf %257, %278 : vector<8x128xf32>
    %280 = math.tanh %279 : vector<8x128xf32>
    %281 = arith.subf %249, %280 : vector<8x128xf32>
    %282 = arith.mulf %277, %281 : vector<8x128xf32>
    %283 = arith.addf %280, %282 : vector<8x128xf32>
    %c8_i32_83 = arith.constant 8 : i32
    %c0_84 = arith.constant 0 : index
    %c0_85 = arith.constant 0 : index
    %284 = vector.load %arg6[%c0_84, %c0_85] : memref<128x128xf32, #tpu.memory_space<vmem>>, vector<128x128xf32>
    %cst_86 = arith.constant dense<0.000000e+00> : vector<8x128xf32>
    %285 = tpu.matmul %283, %284, %cst_86 {dimension_numbers = #tpu.dot_dimension_numbers<[1], [0], [0], [1], [0, 0, 1, 1], [], []>} : vector<8x128xf32>, vector<128x128xf32>, vector<8x128xf32> -> vector<8x128xf32>
    %c0_87 = arith.constant 0 : index
    %c0_88 = arith.constant 0 : index
    %286 = vector.load %arg7[%c0_87, %c0_88] : memref<1x128xf32, #tpu.memory_space<vmem>>, vector<1x128xf32>
    %287 = vector.broadcast %286 : vector<1x128xf32> to vector<8x128xf32>
    %288 = arith.addf %285, %287 : vector<8x128xf32>
    %c0_89 = arith.constant 0 : index
    %c0_90 = arith.constant 0 : index
    %289 = vector.load %arg8[%c0_89, %c0_90] : memref<8x128xf32, #tpu.memory_space<vmem>>, vector<8x128xf32>
    tpu.vector_store %arg8[%c0_89, %c0_90], %288 {strides = array<i32>} : memref<8x128xf32, #tpu.memory_space<vmem>>, vector<8x128xf32>,
    return
  }
  func.func @transform_0(%arg0: i32) -> (i32, i32) {
    %c0_i32 = arith.constant 0 : i32
    %c0_i32_0 = arith.constant 0 : i32
    %c0_i32_1 = arith.constant 0 : i32
    return %c0_i32, %c0_i32_0 : i32, i32
  }
  func.func @transform_1(%arg0: i32) -> (i32, i32) {
    %c0_i32 = arith.constant 0 : i32
    %c0_i32_0 = arith.constant 0 : i32
    %c0_i32_1 = arith.constant 0 : i32
    return %c0_i32, %c0_i32_0 : i32, i32
  }
  func.func @transform_2(%arg0: i32) -> (i32, i32) {
    %c0_i32 = arith.constant 0 : i32
    %c0_i32_0 = arith.constant 0 : i32
    %c0_i32_1 = arith.constant 0 : i32
    return %c0_i32, %c0_i32_0 : i32, i32
  }
  func.func @transform_3(%arg0: i32) -> (i32, i32) {
    %c0_i32 = arith.constant 0 : i32
    %c0_i32_0 = arith.constant 0 : i32
    %c0_i32_1 = arith.constant 0 : i32
    return %c0_i32, %c0_i32_0 : i32, i32
  }
  func.func @transform_4(%arg0: i32) -> (i32, i32) {
    %c0_i32 = arith.constant 0 : i32
    %c0_i32_0 = arith.constant 0 : i32
    %c0_i32_1 = arith.constant 0 : i32
    return %c0_i32, %c0_i32_0 : i32, i32
  }
  func.func @transform_5(%arg0: i32) -> (i32, i32) {
    %c0_i32 = arith.constant 0 : i32
    %c0_i32_0 = arith.constant 0 : i32
    %c0_i32_1 = arith.constant 0 : i32
    return %c0_i32, %c0_i32_0 : i32, i32
  }
  func.func @transform_6(%arg0: i32) -> (i32, i32) {
    %c0_i32 = arith.constant 0 : i32
    %c0_i32_0 = arith.constant 0 : i32
    %c0_i32_1 = arith.constant 0 : i32
    return %c0_i32, %c0_i32_0 : i32, i32
  }
  func.func @transform_7(%arg0: i32) -> (i32, i32) {
    %c0_i32 = arith.constant 0 : i32
    %c0_i32_0 = arith.constant 0 : i32
    %c0_i32_1 = arith.constant 0 : i32
    return %c0_i32, %c0_i32_0 : i32, i32
  }
}

</mosaic_0001>

<bundles_post_ra>
// kernel: tpu_custom_call.1
= control target key start
LH: loop header
LB: loop body
LE: loop exit
PB: predicated region body
PF: predicated region fallthrough
CT: control target
= control target key end

     0   :  { %12 = vsyncpa [#allocation4], 0  ;;  %s3548_s0 = inlined_call_operand.vmem [shape: f32[64,16], index: 0, kind: input, shape index: {}]   ;;  %s3549_s1 = inlined_call_operand.vmem [shape: f32[16,384], index: 1, kind: input, shape index: {}]   ;;  %s3550_s2 = inlined_call_operand.vmem [shape: f32[1,384], index: 2, kind: input, shape index: {}]   ;;  %s3551_s3 = inlined_call_operand.hbm [shape: f32[128,384], index: 3, kind: input, shape index: {}]   ;;  %s3552_s4 = inlined_call_operand.vmem [shape: f32[1,128], index: 4, kind: input, shape index: {}]   ;;  %s3553_s5 = inlined_call_operand.hbm [shape: f32[128,128], index: 5, kind: input, shape index: {}]   ;;  %s3554_s6 = inlined_call_operand.vmem [shape: f32[1,128], index: 6, kind: input, shape index: {}]   ;;  %s3555_s7 = inlined_call_operand.hbm [shape: f32[8,128], index: 7, kind: output, shape index: {}]  }
   0x1   :  { %13 = vsyncpa [#allocation7], 0 }
   0x2   :  { %14 = vsyncpa [#allocation5], 0  ;;  %s2991_s24 = smov [#allocation3]   ;;  %s2919_s28 = scalar_lea.hbm %s3551_s3, 6144 }
   0x3   :  { %s26_s25 = sshll.u32 %s2991_s24, 4  ;;  %p2920_p0 = scmp.ne.s32.totalorder %s3551_s3, %s2919_s28  ;;  %s27_s25 = int_to_ptr.vmem [resolvable:$true] %s26_s25 }
   0x4   :  { %p2923_p1 = scmp.lt.u32.totalorder %s2919_s28, %s3551_s3 }
   0x6   :  { %p2925_p2 = pnand %p2923_p1, %p2920_p0 }
   0x8   :  { %2928 = shalt.err (!%p2925_p2)
}
   0x9   :  { %s2929_s10 = scalar_lea.vmem %s27_s25, 6144  ;;  %p2934_p4 = scmp.lt.s32.totalorder %s27_s25, %s27_s25 }
   0xa   :  { %p2930_p3 = scmp.ne.s32.totalorder %s27_s25, %s2929_s10  ;;  %p2935_p5 = scmp.lt.s32.totalorder %s2929_s10, %s2929_s10 }
   0xc   :  { %p2936_p6 = por %p2935_p5, %p2934_p4 }
   0xe   :  { %p2937_p7 = pnand %p2936_p6, %p2930_p3 }
  0x10   :  { %2940 = shalt.err (!%p2937_p7)
}
  0x11   :  { %s2992_s11 = smov 384   ;;  %s2993_s12 = smov 24  }
  0x12   :  { %32 = dma.hbm_to_vmem [thread:$0]  %s3551_s3, 6144, %s27_s25, [#allocation4], %s2992_s11, %s2992_s11, %s2993_s12  }
  0x13   :  { %s2994_s15 = smov [#allocation6]   ;;  %s2941_s19 = scalar_lea.hbm %s3553_s5, 2048 }
  0x14   :  { %s40_s16 = sshll.u32 %s2994_s15, 4  ;;  %p2942_p8 = scmp.ne.s32.totalorder %s3553_s5, %s2941_s19  ;;  %s41_s16 = int_to_ptr.vmem [resolvable:$true] %s40_s16 }
  0x15   :  { %p2945_p9 = scmp.lt.u32.totalorder %s2941_s19, %s3553_s5 }
  0x17   :  { %p2947_p10 = pnand %p2945_p9, %p2942_p8 }
  0x19   :  { %2950 = shalt.err (!%p2947_p10)
}
  0x1a   :  { %s2951_s24 = scalar_lea.vmem %s41_s16, 2048  ;;  %p2956_p12 = scmp.lt.s32.totalorder %s41_s16, %s41_s16 }
  0x1b   :  { %p2952_p11 = scmp.ne.s32.totalorder %s41_s16, %s2951_s24  ;;  %p2957_p13 = scmp.lt.s32.totalorder %s2951_s24, %s2951_s24 }
  0x1d   :  { %p2958_p0 = por %p2957_p13, %p2956_p12 }
  0x1f   :  { %p2959_p1 = pnand %p2958_p0, %p2952_p11 }
  0x21   :  { %2962 = shalt.err (!%p2959_p1)
}
  0x22   :  { %s2995_s3 = smov 128   ;;  %s2996_s25 = smov 8  }
  0x23   :  { %46 = dma.hbm_to_vmem [thread:$0]  %s3553_s5, 2048, %s41_s16, [#allocation7], %s2995_s3, %s2995_s3, %s2996_s25  }
  0x24   :  { %2985 = dma.done.wait [#allocation4], 6144  }
  0x25   :  { %2986 = vsyncadd [#allocation4], 4294961152 }
  0x26   :  { %2987 = dma.done.wait [#allocation7], 2048  }
  0x27   :  { %2988 = vsyncadd [#allocation7], 4294965248  ;;  %v2997_v0 = vmov 0.0   ;;  %v64_v1 = vld [vmem:[%s3549_s1 + $0x8] sm:$0xff]  ;;  %v67_v2 = vld [vmem:[%s3549_s1 + $0x20] sm:$0xff]  ;;  %vm86_vm0 = vcmask 130048  }
  0x28   :  { %175 = vmatprep.mubr.f32.mxu0 %v2997_v0  ;;  %v63_v3 = vld [vmem:[%s3549_s1] sm:$0xff]  ;;  %v2349_v4 = vpack.c.bf16 %v67_v2, %v64_v1  ;;  %v66_v5 = vld [vmem:[%s3549_s1 + $0x18] sm:$0xff]  ;;  %v357_v9 = vld [vmem:[#allocation3 + $0x20] sm:$0xff]  ;;  %v2998_v40 = vmov 0.0|0.0   ;;  %vm2999_vm1 = vmmov 0   ;;  %s3000_s10 = smov [#allocation8]  }
  0x29   :  { %v55_v6 = vld [vmem:[%s3548_s0] sm:$0xff]  ;;  %v354_v7 = vld [vmem:[#allocation3 + $0x8] sm:$0xff]  ;;  %v2351_v8 = vpack.c.bf16 %v66_v5, %v63_v3  ;;  %v353_v10 = vld [vmem:[#allocation3] sm:$0xff]  ;;  %s1820_s5 = sshll.u32 %s3000_s10, 4  ;;  %s1821_s5 = int_to_ptr.vmem [resolvable:$true] %s1820_s5 }
  0x2a   :  { %v356_v11 = vld [vmem:[#allocation3 + $0x18] sm:$0xff]  ;;  %2022 = vmatprep.mubr.msk.f32.mxu1 %vm86_vm0, %v55_v6  ;;  %2350 = vmatprep.subr.bf16.mxu0 %v2349_v4  ;;  %v3082_v12 = vpack.c.bf16 %v357_v9, %v354_v7  ;;  %v363_v14 = vld [vmem:[#allocation3 + $0x50] sm:$0xff]  ;;  %v362_v18 = vld [vmem:[#allocation3 + $0x48] sm:$0xff]  ;;  %s2963_s11 = scalar_lea.vmem %s1821_s5, 128  ;;  %p2968_p3 = scmp.lt.s32.totalorder %s1821_s5, %s1821_s5 }
  0x2b   :  { %v360_v13 = vld [vmem:[#allocation3 + $0x38] sm:$0xff]  ;;  %2352 = vmatpush1.bf16.msra.mxu0 %v2351_v8  ;;  %v3084_v15 = vpack.c.bf16 %v356_v11, %v353_v10  ;;  %v359_v17 = vld [vmem:[#allocation3 + $0x30] sm:$0xff]  ;;  %v366_v19 = vld [vmem:[#allocation3 + $0x68] sm:$0xff]  ;;  %p2964_p2 = scmp.ne.s32.totalorder %s1821_s5, %s2963_s11  ;;  %p2969_p4 = scmp.lt.s32.totalorder %s2963_s11, %s2963_s11 }
  0x2c   :  { %2358 = vmatprep.subr.bf16.mxu0 %v3082_v12  ;;  %v3087_v16 = vpack.c.bf16 %v363_v14, %v360_v13  ;;  %v369_v20 = vld [vmem:[#allocation3 + $0x80] sm:$0xff]  ;;  %v68_v22 = vld [vmem:[%s3549_s1 + $0x28] sm:$0xff]  ;;  %v3101_v24 = vpack.c.bf16 %v362_v18, %v359_v17  ;;  %v375_v30 = vld [vmem:[#allocation3 + $0xb0] sm:$0xff] }
  0x2d   :  { %v65_v21 = vld [vmem:[%s3549_s1 + $0x10] sm:$0xff]  ;;  %v56_v23 = vld [vmem:[%s3548_s0 + $0x8] sm:$0xff]  ;;  %v3104_v26 = vpack.c.bf16 %v369_v20, %v366_v19  ;;  %v355_v31 = vld [vmem:[#allocation3 + $0x10] sm:$0xff]  ;;  %p2970_p5 = por %p2969_p4, %p2968_p3 }
  0x2e   :  { %1837 = vmatmul.mubr.msk.f32.vlgmr.msra.gmra.mrb[0].mxu0 %vm86_vm0, %v55_v6  ;;  %v2353_v25 = vpack.c.bf16 %v68_v22, %v65_v21  ;;  %v365_v27 = vld [vmem:[#allocation3 + $0x60] sm:$0xff]  ;;  %v368_v28 = vld [vmem:[#allocation3 + $0x78] sm:$0xff]  ;;  %v358_v32 = vld [vmem:[#allocation3 + $0x28] sm:$0xff] }
  0x2f   :  { %2360 = vmatpush1.bf16.msra.mxu0 %v3084_v15  ;;  %181 = vmatprep.mubr.f32.mxu0 %v2997_v0  ;;  %v372_v29 = vld [vmem:[#allocation3 + $0x98] sm:$0xff]  ;;  %v3107_v33 = vpack.c.bf16 %v358_v32, %v355_v31  ;;  %v57_v34 = vld [vmem:[%s3548_s0 + $0x10] sm:$0xff]  ;;  %v3114_v35 = vpack.c.bf16 %v368_v28, %v365_v27  ;;  %v371_v38 = vld [vmem:[#allocation3 + $0x90] sm:$0xff]  ;;  %p2971_p6 = pnand %p2970_p5, %p2964_p2 }
  0x30   :  { %2362 = vmatprep.subr.bf16.mxu0 %v3087_v16  ;;  %2354 = vmatprep.subr.bf16.mxu1 %v2353_v25  ;;  %v361_v36 = vld [vmem:[#allocation3 + $0x40] sm:$0xff]  ;;  %v3117_v37 = vpack.c.bf16 %v375_v30, %v372_v29  ;;  %v374_v39 = vld [vmem:[#allocation3 + $0xa8] sm:$0xff]  ;;  %v364_v41 = vld [vmem:[#allocation3 + $0x58] sm:$0xff] }
  0x31   :  { %2356 = vmatpush3.bf16.msra.mxu1 %v2353_v25  ;;  %v378_v42 = vld [vmem:[#allocation3 + $0xc8] sm:$0xff]  ;;  %v381_v43 = vld [vmem:[#allocation3 + $0xe0] sm:$0xff]  ;;  %v3123_v44 = vpack.c.bf16 %v364_v41, %v361_v36  ;;  %v3130_v46 = vpack.c.bf16 %v374_v39, %v371_v38  ;;  %v367_v47 = vld [vmem:[#allocation3 + $0x70] sm:$0xff] }
  0x32   :  { %1838 = vmatmul.mubr.msk.f32.gmra.mrb[2].mxu0 %vm86_vm0, %v56_v23  ;;  %2389 = vmatprep.subr.bf16.mxu1 %v2998_v40  ;;  %v58_v45 = vld [vmem:[%s3548_s0 + $0x18] sm:$0xff]  ;;  %v3133_v49 = vpack.c.bf16 %v381_v43, %v378_v42  ;;  %v377_v50 = vld [vmem:[#allocation3 + $0xc0] sm:$0xff]  ;;  %v380_v51 = vld [vmem:[#allocation3 + $0xd8] sm:$0xff] }
  0x33   :  { %2364 = vmatpush1.bf16.msra.mxu0 %v3101_v24  ;;  %187 = vmatprep.mubr.f32.mxu0 %v2997_v0  ;;  %v370_v48 = vld [vmem:[#allocation3 + $0x88] sm:$0xff]  ;;  %v384_v52 = vld [vmem:[#allocation3 + $0xf8] sm:$0xff]  ;;  %v387_v53 = vld [vmem:[#allocation3 + $0x110] sm:$0xff]  ;;  %v3146_v56 = vpack.c.bf16 %v380_v51, %v377_v50 }
  0x34   :  { %2366 = vmatprep.subr.bf16.mxu0 %v3104_v26  ;;  %2023 = vmatmul.mubr.msk.f32.vlgmr.msra.gmra.mrb[0].mxu1 %vm86_vm0, %v56_v23  ;;  %v3139_v54 = vpack.c.bf16 %v370_v48, %v367_v47  ;;  %v59_v55 = vld [vmem:[%s3548_s0 + $0x20] sm:$0xff]  ;;  %v373_v57 = vld [vmem:[#allocation3 + $0xa0] sm:$0xff]  ;;  %v376_v58 = vld [vmem:[#allocation3 + $0xb8] sm:$0xff]  ;;  %v3149_v59 = vpack.c.bf16 %v387_v53, %v384_v52 }
  0x35   :  { %2391 = vmatpush3.bf16.msra.mxu1 %v3107_v33  ;;  %2025 = vmatprep.mubr.msk.f32.mxu1 %vm86_vm0, %v57_v34  ;;  %v383_v60 = vld [vmem:[#allocation3 + $0xf0] sm:$0xff]  ;;  %v386_v61 = vld [vmem:[#allocation3 + $0x108] sm:$0xff]  ;;  %v393_v63 = vld [vmem:[#allocation3 + $0x140] sm:$0xff]  ;;  %v3155_v1 = vpack.c.bf16 %v376_v58, %v373_v57 }
  0x36   :  { %1839 = vmatmul.mubr.msk.f32.gmra.mrb[4].mxu0 %vm86_vm0, %v57_v34  ;;  %2392 = vmatprep.subr.bf16.mxu1 %v2998_v40  ;;  %v390_v62 = vld [vmem:[#allocation3 + $0x128] sm:$0xff]  ;;  %v60_v2 = vld [vmem:[%s3548_s0 + $0x28] sm:$0xff]  ;;  %v3162_v3 = vpack.c.bf16 %v386_v61, %v383_v60  ;;  %v379_v4 = vld [vmem:[#allocation3 + $0xd0] sm:$0xff]  ;;  %v71_v34 = vlaneseq }
  0x37   :  { %2368 = vmatpush1.bf16.msra.mxu0 %v3114_v35  ;;  %193 = vmatprep.mubr.f32.mxu0 %v2997_v0  ;;  %v382_v5 = vld [vmem:[#allocation3 + $0xe8] sm:$0xff]  ;;  %v3165_v6 = vpack.c.bf16 %v393_v63, %v390_v62  ;;  %v389_v7 = vld [vmem:[#allocation3 + $0x120] sm:$0xff]  ;;  %v392_v8 = vld [vmem:[#allocation3 + $0x138] sm:$0xff] }
  0x38   :  { %2370 = vmatprep.subr.bf16.mxu0 %v3117_v37  ;;  %2026 = vmatmul.mubr.msk.f32.gmra.mrb[2].mxu1 %vm86_vm0, %v58_v45  ;;  %v396_v9 = vld [vmem:[#allocation3 + $0x158] sm:$0xff]  ;;  %v399_v10 = vld [vmem:[#allocation3 + $0x170] sm:$0xff]  ;;  %v3171_v11 = vpack.c.bf16 %v382_v5, %v379_v4  ;;  %v61_v13 = vld [vmem:[%s3548_s0 + $0x30] sm:$0xff]  ;;  %v3178_v14 = vpack.c.bf16 %v392_v8, %v389_v7  ;;  %v72_v36 = vshrl.u32 %v71_v34, 7 }
  0x39   :  { %2394 = vmatpush3.bf16.msra.mxu1 %v3123_v44  ;;  %2028 = vmatprep.mubr.msk.f32.mxu1 %vm86_vm0, %v59_v55  ;;  %v385_v17 = vld [vmem:[#allocation3 + $0x100] sm:$0xff]  ;;  %v388_v18 = vld [vmem:[#allocation3 + $0x118] sm:$0xff]  ;;  %v3181_v19 = vpack.c.bf16 %v399_v10, %v396_v9  ;;  %v395_v20 = vld [vmem:[#allocation3 + $0x150] sm:$0xff] }
  0x3a   :  { %1840 = vmatmul.mubr.msk.f32.gmra.mrb[6].mxu0 %vm86_vm0, %v58_v45  ;;  %2395 = vmatprep.subr.bf16.mxu1 %v2998_v40  ;;  %v398_v21 = vld [vmem:[#allocation3 + $0x168] sm:$0xff]  ;;  %v3187_v22 = vpack.c.bf16 %v388_v18, %v385_v17  ;;  %v391_v27 = vld [vmem:[#allocation3 + $0x130] sm:$0xff]  ;;  %v397_v30 = vld [vmem:[#allocation3 + $0x160] sm:$0xff]  ;;  %v81_v38 = vsub.s32 2, %v72_v36  ;;  %v73_v57 = vsub.s32 0, %v72_v36  ;;  %v77_v8 = vsub.s32 1, %v72_v36 }
  0x3b   :  { %2372 = vmatpush1.bf16.msra.mxu0 %v3130_v46  ;;  %199 = vmatprep.mubr.f32.mxu0 %v2997_v0  ;;  %v62_v23 = vld [vmem:[%s3548_s0 + $0x38] sm:$0xff]  ;;  %v3194_v25 = vpack.c.bf16 %v398_v21, %v395_v20  ;;  %v400_v31 = vld [vmem:[#allocation3 + $0x178] sm:$0xff]  ;;  %v69_v39 = vld [vmem:[%s3550_s2] sm:$0x7] }
  0x3c   :  { %2374 = vmatprep.subr.bf16.mxu0 %v3133_v49  ;;  %2029 = vmatmul.mubr.msk.f32.gmra.mrb[4].mxu1 %vm86_vm0, %v60_v2  ;;  %v394_v28 = vld [vmem:[#allocation3 + $0x148] sm:$0xff]  ;;  %v3212_v32 = vpack.c.bf16 %v400_v31, %v397_v30  ;;  %v82_v41 = vrot.slane %v69_v39, %v81_v38  ;;  %v3266_v60 = vrot.slane %v69_v39, %v73_v57  ;;  %v3279_v20 = vld [vmem:[%s3552_s4] ss:$0 sm:$0xff] }
  0x3d   :  { %2397 = vmatpush3.bf16.msra.mxu1 %v3139_v54  ;;  %2031 = vmatprep.mubr.msk.f32.mxu1 %vm86_vm0, %v61_v13  ;;  %v3201_v29 = vpack.c.bf16 %v394_v28, %v391_v27  ;;  %v3273_v10 = vrot.slane %v69_v39, %v77_v8 }
  0x3e   :  { %1841 = vmatmul.mubr.msk.f32.gmra.mrb[8].mxu0 %vm86_vm0, %v59_v55  ;;  %2398 = vmatprep.subr.bf16.mxu1 %v2998_v40 }
  0x3f   :  { %2376 = vmatpush1.bf16.msra.mxu0 %v3146_v56  ;;  %205 = vmatprep.mubr.f32.mxu0 %v2997_v0 }
  0x40   :  { %2378 = vmatprep.subr.bf16.mxu0 %v3149_v59  ;;  %2032 = vmatmul.mubr.msk.f32.gmra.mrb[6].mxu1 %vm86_vm0, %v62_v23 }
  0x41   :  { %2400 = vmatpush3.bf16.msra.mxu1 %v3155_v1  ;;  %2066 = vmatprep.mubr.msk.f32.mxu1 %vm2999_vm1, %v2997_v0 }
  0x42   :  { %1842 = vmatmul.mubr.msk.f32.gmra.mrb[10].mxu0 %vm86_vm0, %v60_v2  ;;  %2401 = vmatprep.subr.bf16.mxu1 %v2998_v40 }
  0x43   :  { %2380 = vmatpush1.bf16.msra.mxu0 %v3162_v3  ;;  %211 = vmatprep.mubr.f32.mxu0 %v2997_v0 }
  0x44   :  { %2382 = vmatprep.subr.bf16.mxu0 %v3165_v6 }
  0x45   :  { %2403 = vmatpush3.bf16.msra.mxu1 %v3171_v11 }
  0x46   :  { %1843 = vmatmul.mubr.msk.f32.gmra.mrb[12].mxu0 %vm86_vm0, %v61_v13  ;;  %2404 = vmatprep.subr.bf16.mxu1 %v2998_v40 }
  0x47   :  { %2384 = vmatpush1.bf16.msra.mxu0 %v3178_v14  ;;  %217 = vmatprep.mubr.f32.mxu0 %v2997_v0 }
  0x48   :  { %2386 = vmatprep.subr.bf16.mxu0 %v3181_v19 }
  0x49   :  { %2406 = vmatpush3.bf16.msra.mxu1 %v3187_v22 }
  0x4a   :  { %1844 = vmatmul.mubr.msk.f32.gmra.mrb[14].mxu0 %vm86_vm0, %v62_v23  ;;  %2407 = vmatprep.subr.bf16.mxu1 %v2998_v40 }
  0x4b   :  { %2388 = vmatpush1.bf16.msra.mxu0 %v3194_v25  ;;  %478 = vmatprep.mubr.f32.mxu0 %v2997_v0 }
  0x4c   :  { %2414 = vmatprep.subr.bf16.mxu0 %v3082_v12 }
  0x4d   :  { %2409 = vmatpush3.bf16.msra.mxu1 %v3201_v29 }
  0x4e   :  { %479 = vmatmul.mubr.f32.vlgmr.msra.gmra.mrb[0].mxu0 %v2997_v0  ;;  %2410 = vmatprep.subr.bf16.mxu1 %v2998_v40 }
  0x4f   :  { %2416 = vmatpush1.bf16.msra.mxu0 %v3084_v15  ;;  %642 = vmatprep.mubr.f32.mxu0 %v2997_v0 }
  0x50   :  { %2418 = vmatprep.subr.bf16.mxu0 %v3087_v16 }
  0x51   :  { %2412 = vmatpush3.bf16.msra.mxu1 %v3212_v32 }
  0x52   :  { %2445 = vmatprep.subr.bf16.mxu1 %v2998_v40 }
  0x53   :  { %2420 = vmatpush1.bf16.msra.mxu0 %v3101_v24 }
  0x54   :  { %2422 = vmatprep.subr.bf16.mxu0 %v3104_v26  ;;  %2067 = vmatmul.mubr.f32.vlgmr.msra.gmra.mrb[8].mxu1 %v2997_v0 }
  0x55   :  { %2447 = vmatpush3.bf16.msra.mxu1 %v3107_v33  ;;  %2101 = vmatprep.mubr.msk.f32.mxu1 %vm2999_vm1, %v2997_v0 }
  0x56   :  { %2448 = vmatprep.subr.bf16.mxu1 %v2998_v40 }
  0x57   :  { %2424 = vmatpush1.bf16.msra.mxu0 %v3114_v35 }
  0x58   :  { %2426 = vmatprep.subr.bf16.mxu0 %v3117_v37 }
  0x59   :  { %2450 = vmatpush3.bf16.msra.mxu1 %v3123_v44 }
  0x5a   :  { %2451 = vmatprep.subr.bf16.mxu1 %v2998_v40 }
  0x5b   :  { %2428 = vmatpush1.bf16.msra.mxu0 %v3130_v46 }
  0x5c   :  { %2430 = vmatprep.subr.bf16.mxu0 %v3133_v49 }
  0x5d   :  { %2453 = vmatpush3.bf16.msra.mxu1 %v3139_v54 }
  0x5e   :  { %2454 = vmatprep.subr.bf16.mxu1 %v2998_v40 }
  0x5f   :  { %2432 = vmatpush1.bf16.msra.mxu0 %v3146_v56 }
  0x60   :  { %2434 = vmatprep.subr.bf16.mxu0 %v3149_v59 }
  0x61   :  { %2456 = vmatpush3.bf16.msra.mxu1 %v3155_v1 }
  0x62   :  { %2457 = vmatprep.subr.bf16.mxu1 %v2998_v40 }
  0x63   :  { %2436 = vmatpush1.bf16.msra.mxu0 %v3162_v3 }
  0x64   :  { %2438 = vmatprep.subr.bf16.mxu0 %v3165_v6 }
  0x65   :  { %2459 = vmatpush3.bf16.msra.mxu1 %v3171_v11 }
  0x66   :  { %2460 = vmatprep.subr.bf16.mxu1 %v2998_v40 }
  0x67   :  { %2440 = vmatpush1.bf16.msra.mxu0 %v3178_v14 }
  0x68   :  { %2442 = vmatprep.subr.bf16.mxu0 %v3181_v19 }
  0x69   :  { %2462 = vmatpush3.bf16.msra.mxu1 %v3187_v22 }
  0x6a   :  { %2463 = vmatprep.subr.bf16.mxu1 %v2998_v40 }
  0x6b   :  { %2444 = vmatpush1.bf16.msra.mxu0 %v3194_v25 }
  0x6c   :  { %2470 = vmatprep.subr.bf16.mxu0 %v3082_v12 }
  0x6d   :  { %2465 = vmatpush3.bf16.msra.mxu1 %v3201_v29 }
  0x6e   :  { %2466 = vmatprep.subr.bf16.mxu1 %v2998_v40 }
  0x71   :  { %2468 = vmatpush3.bf16.msra.mxu1 %v3212_v32 }
  0x72   :  { %2501 = vmatprep.subr.bf16.mxu1 %v2998_v40 }
 0x107   :  { %v2024_v42 = vpop.f32.mrb[0].mxu1 }
 0x108   :  { %v3256_v43 = vadd.f32 %v2024_v42, %v82_v41  ;;  %v290_v45 = vpop.f32.mrb[1].mxu1 }
 0x109   :  { %v291_v31 = vadd.f32 %v290_v45, %v82_v41 }
 0x10b   :  { %v2027_v47 = vpop.f32.mrb[2].mxu1 }
 0x10c   :  { %v3258_v48 = vadd.f32 %v2027_v47, %v82_v41  ;;  %v300_v50 = vpop.f32.mrb[3].mxu1 }
 0x10d   :  { %v3260_v51 = vadd.f32 %v300_v50, %v82_v41 }
 0x10f   :  { %v2030_v52 = vpop.f32.mrb[4].mxu1 }
 0x110   :  { %v3262_v53 = vadd.f32 %v2030_v52, %v82_v41  ;;  %v310_v55 = vpop.f32.mrb[5].mxu1 }
 0x111   :  { %v3264_v58 = vadd.f32 %v310_v55, %v82_v41 }
 0x113   :  { %v2033_v61 = vpop.f32.mrb[6].mxu1 }
 0x114   :  { %v3268_v62 = vadd.f32 %v2033_v61, %v82_v41  ;;  %v320_v63 = vpop.f32.mrb[7].mxu1 }
 0x115   :  { %v3270_v4 = vadd.f32 %v320_v63, %v82_v41 }
 0x121   :  { %v480_v2 = vpop.f32.mrb[0].mxu0 }
 0x122   :  { %v2829_v5 = vadd.f32 %v480_v2, %v3266_v60  ;;  %v482_v7 = vpop.f32.mrb[1].mxu0 }
 0x123   :  { %v2830_v18 = vadd.f32 %v482_v7, %v3273_v10 }
 0x124   :  { %v557_v9 = vmul.f32 0.5, %v2829_v5 }
 0x125   :  { %v562_v21 = vmul.f32 0.5, %v2830_v18 }
 0x126   :  { %2871 = vtanh.f32 %v557_v9 }
 0x127   :  { %v551_v13 = vpop.f32.mrb[8].mxu1  ;;  %2873 = vtanh.f32 %v562_v21 }
 0x128   :  { %v2068_v17 = vpop.f32.mrb[9].mxu1  ;;  %v555_v28 = vadd.f32 %v3279_v20, %v551_v13 }
 0x130   :  { %v2872_v23 = vpop.eup %2871 }
 0x131   :  { %v559_v27 = vmul.f32 0.5, %v2872_v23  ;;  %v2874_v38 = vpop.eup %2873 }
 0x132   :  { %v564_v39 = vmul.f32 0.5, %v2874_v38 }
 0x133   :  { %v560_v30 = vadd.f32 0.5, %v559_v27 }
 0x134   :  { %v565_v47 = vadd.f32 0.5, %v564_v39 }
 0x135   :  { %v566_v34 = vmul.f32 %v560_v30, %v555_v28 }
 0x137   :  { %v567_v36 = vadd.f32 %v566_v34, %v291_v31 }
 0x139   :  { %2875 = vtanh.f32 %v567_v36 }
 0x143   :  { %v2876_v42 = vpop.eup %2875 }
 0x144   :  { %v569_v50 = vsub.f32 0.0, %v2876_v42 }
 0x146   :  { %v570_v52 = vmul.f32 %v569_v50, %v565_v47 }
 0x148   :  { %v571_v55 = vadd.f32 %v2876_v42, %v570_v52 }
 0x14a   :  { %643 = vmatmul.mubr.f32.vlgmr.msra.gmra.mrb[2].mxu0 %v571_v55  ;;  %2102 = vmatmul.mubr.f32.vlgmr.msra.gmra.mrb[10].mxu1 %v571_v55 }
 0x14b   :  { %2472 = vmatpush1.bf16.msra.mxu0 %v3084_v15  ;;  %2503 = vmatpush3.bf16.msra.mxu1 %v3107_v33 }
 0x14c   :  { %2474 = vmatprep.subr.bf16.mxu0 %v3087_v16  ;;  %2504 = vmatprep.subr.bf16.mxu1 %v2998_v40 }
 0x14d   :  { %806 = vmatprep.mubr.f32.mxu0 %v2997_v0  ;;  %2136 = vmatprep.mubr.msk.f32.mxu1 %vm2999_vm1, %v2997_v0 }
 0x14f   :  { %2476 = vmatpush1.bf16.msra.mxu0 %v3101_v24  ;;  %2506 = vmatpush3.bf16.msra.mxu1 %v3123_v44 }
 0x150   :  { %2478 = vmatprep.subr.bf16.mxu0 %v3104_v26  ;;  %2507 = vmatprep.subr.bf16.mxu1 %v2998_v40 }
 0x153   :  { %2480 = vmatpush1.bf16.msra.mxu0 %v3114_v35  ;;  %2509 = vmatpush3.bf16.msra.mxu1 %v3139_v54 }
 0x154   :  { %2482 = vmatprep.subr.bf16.mxu0 %v3117_v37  ;;  %2510 = vmatprep.subr.bf16.mxu1 %v2998_v40 }
 0x157   :  { %2484 = vmatpush1.bf16.msra.mxu0 %v3130_v46  ;;  %2512 = vmatpush3.bf16.msra.mxu1 %v3155_v1 }
 0x158   :  { %2486 = vmatprep.subr.bf16.mxu0 %v3133_v49  ;;  %2513 = vmatprep.subr.bf16.mxu1 %v2998_v40 }
 0x15b   :  { %2488 = vmatpush1.bf16.msra.mxu0 %v3146_v56  ;;  %2515 = vmatpush3.bf16.msra.mxu1 %v3171_v11 }
 0x15c   :  { %2490 = vmatprep.subr.bf16.mxu0 %v3149_v59  ;;  %2516 = vmatprep.subr.bf16.mxu1 %v2998_v40 }
 0x15f   :  { %2492 = vmatpush1.bf16.msra.mxu0 %v3162_v3  ;;  %2518 = vmatpush3.bf16.msra.mxu1 %v3187_v22 }
 0x160   :  { %2494 = vmatprep.subr.bf16.mxu0 %v3165_v6  ;;  %2519 = vmatprep.subr.bf16.mxu1 %v2998_v40 }
 0x163   :  { %2496 = vmatpush1.bf16.msra.mxu0 %v3178_v14  ;;  %2521 = vmatpush3.bf16.msra.mxu1 %v3201_v29 }
 0x164   :  { %2498 = vmatprep.subr.bf16.mxu0 %v3181_v19  ;;  %2522 = vmatprep.subr.bf16.mxu1 %v2998_v40 }
 0x167   :  { %2500 = vmatpush1.bf16.msra.mxu0 %v3194_v25  ;;  %2524 = vmatpush3.bf16.msra.mxu1 %v3212_v32 }
 0x168   :  { %2526 = vmatprep.subr.bf16.mxu0 %v3082_v12  ;;  %2557 = vmatprep.subr.bf16.mxu1 %v2998_v40 }
 0x21d   :  { %v644_v41 = vpop.f32.mrb[2].mxu0  ;;  %v715_v45 = vpop.f32.mrb[10].mxu1 }
 0x21e   :  { %v2831_v57 = vadd.f32 %v644_v41, %v3266_v60  ;;  %v646_v61 = vpop.f32.mrb[3].mxu0  ;;  %v2103_v63 = vpop.f32.mrb[11].mxu1  ;;  %v719_v13 = vadd.f32 %v3279_v20, %v715_v45 }
 0x21f   :  { %v2832_v5 = vadd.f32 %v646_v61, %v3273_v10 }
 0x220   :  { %v721_v2 = vmul.f32 0.5, %v2831_v57 }
 0x221   :  { %v726_v7 = vmul.f32 0.5, %v2832_v5 }
 0x222   :  { %2877 = vtanh.f32 %v721_v2 }
 0x223   :  { %2879 = vtanh.f32 %v726_v7 }
 0x22c   :  { %v2878_v8 = vpop.eup %2877 }
 0x22d   :  { %v723_v9 = vmul.f32 0.5, %v2878_v8  ;;  %v2880_v23 = vpop.eup %2879 }
 0x22e   :  { %v728_v27 = vmul.f32 0.5, %v2880_v23 }
 0x22f   :  { %v724_v17 = vadd.f32 0.5, %v723_v9 }
 0x230   :  { %v729_v30 = vadd.f32 0.5, %v728_v27 }
 0x231   :  { %v730_v18 = vmul.f32 %v724_v17, %v719_v13 }
 0x233   :  { %v731_v21 = vadd.f32 %v730_v18, %v3256_v43 }
 0x235   :  { %2881 = vtanh.f32 %v731_v21 }
 0x23f   :  { %v2882_v28 = vpop.eup %2881 }
 0x240   :  { %v733_v31 = vsub.f32 %v571_v55, %v2882_v28 }
 0x242   :  { %v734_v34 = vmul.f32 %v733_v31, %v729_v30 }
 0x244   :  { %v735_v36 = vadd.f32 %v2882_v28, %v734_v34 }
 0x246   :  { %807 = vmatmul.mubr.f32.vlgmr.msra.gmra.mrb[4].mxu0 %v735_v36  ;;  %2137 = vmatmul.mubr.f32.vlgmr.msra.gmra.mrb[12].mxu1 %v735_v36 }
 0x247   :  { %2528 = vmatpush1.bf16.msra.mxu0 %v3084_v15  ;;  %2559 = vmatpush3.bf16.msra.mxu1 %v3107_v33 }
 0x248   :  { %2530 = vmatprep.subr.bf16.mxu0 %v3087_v16  ;;  %2560 = vmatprep.subr.bf16.mxu1 %v2998_v40 }
 0x249   :  { %970 = vmatprep.mubr.f32.mxu0 %v2997_v0  ;;  %2171 = vmatprep.mubr.msk.f32.mxu1 %vm2999_vm1, %v2997_v0 }
 0x24b   :  { %2532 = vmatpush1.bf16.msra.mxu0 %v3101_v24  ;;  %2562 = vmatpush3.bf16.msra.mxu1 %v3123_v44 }
 0x24c   :  { %2534 = vmatprep.subr.bf16.mxu0 %v3104_v26  ;;  %2563 = vmatprep.subr.bf16.mxu1 %v2998_v40 }
 0x24f   :  { %2536 = vmatpush1.bf16.msra.mxu0 %v3114_v35  ;;  %2565 = vmatpush3.bf16.msra.mxu1 %v3139_v54 }
 0x250   :  { %2538 = vmatprep.subr.bf16.mxu0 %v3117_v37  ;;  %2566 = vmatprep.subr.bf16.mxu1 %v2998_v40 }
 0x253   :  { %2540 = vmatpush1.bf16.msra.mxu0 %v3130_v46  ;;  %2568 = vmatpush3.bf16.msra.mxu1 %v3155_v1 }
 0x254   :  { %2542 = vmatprep.subr.bf16.mxu0 %v3133_v49  ;;  %2569 = vmatprep.subr.bf16.mxu1 %v2998_v40 }
 0x257   :  { %2544 = vmatpush1.bf16.msra.mxu0 %v3146_v56  ;;  %2571 = vmatpush3.bf16.msra.mxu1 %v3171_v11 }
 0x258   :  { %2546 = vmatprep.subr.bf16.mxu0 %v3149_v59  ;;  %2572 = vmatprep.subr.bf16.mxu1 %v2998_v40 }
 0x25b   :  { %2548 = vmatpush1.bf16.msra.mxu0 %v3162_v3  ;;  %2574 = vmatpush3.bf16.msra.mxu1 %v3187_v22 }
 0x25c   :  { %2550 = vmatprep.subr.bf16.mxu0 %v3165_v6  ;;  %2575 = vmatprep.subr.bf16.mxu1 %v2998_v40 }
 0x25f   :  { %2552 = vmatpush1.bf16.msra.mxu0 %v3178_v14  ;;  %2577 = vmatpush3.bf16.msra.mxu1 %v3201_v29 }
 0x260   :  { %2554 = vmatprep.subr.bf16.mxu0 %v3181_v19  ;;  %2578 = vmatprep.subr.bf16.mxu1 %v2998_v40 }
 0x263   :  { %2556 = vmatpush1.bf16.msra.mxu0 %v3194_v25  ;;  %2580 = vmatpush3.bf16.msra.mxu1 %v3212_v32 }
 0x264   :  { %2582 = vmatprep.subr.bf16.mxu0 %v3082_v12  ;;  %2613 = vmatprep.subr.bf16.mxu1 %v2998_v40 }
 0x319   :  { %v808_v43 = vpop.f32.mrb[4].mxu0  ;;  %v879_v38 = vpop.f32.mrb[12].mxu1 }
 0x31a   :  { %v2833_v39 = vadd.f32 %v808_v43, %v3266_v60  ;;  %v810_v42 = vpop.f32.mrb[5].mxu0  ;;  %v2138_v47 = vpop.f32.mrb[13].mxu1  ;;  %v883_v57 = vadd.f32 %v3279_v20, %v879_v38 }
 0x31b   :  { %v2834_v52 = vadd.f32 %v810_v42, %v3273_v10 }
 0x31c   :  { %v885_v50 = vmul.f32 0.5, %v2833_v39 }
 0x31d   :  { %v890_v55 = vmul.f32 0.5, %v2834_v52 }
 0x31e   :  { %2883 = vtanh.f32 %v885_v50 }
 0x31f   :  { %2885 = vtanh.f32 %v890_v55 }
 0x328   :  { %v2884_v41 = vpop.eup %2883 }
 0x329   :  { %v887_v45 = vmul.f32 0.5, %v2884_v41  ;;  %v2886_v5 = vpop.eup %2885 }
 0x32a   :  { %v892_v7 = vmul.f32 0.5, %v2886_v5 }
 0x32b   :  { %v888_v61 = vadd.f32 0.5, %v887_v45 }
 0x32c   :  { %v893_v9 = vadd.f32 0.5, %v892_v7 }
 0x32d   :  { %v894_v63 = vmul.f32 %v888_v61, %v883_v57 }
 0x32f   :  { %v895_v2 = vadd.f32 %v894_v63, %v3260_v51 }
 0x331   :  { %2887 = vtanh.f32 %v895_v2 }
 0x33b   :  { %v2888_v8 = vpop.eup %2887 }
 0x33c   :  { %v897_v13 = vsub.f32 %v735_v36, %v2888_v8 }
 0x33e   :  { %v898_v17 = vmul.f32 %v897_v13, %v893_v9 }
 0x340   :  { %v899_v18 = vadd.f32 %v2888_v8, %v898_v17 }
 0x342   :  { %971 = vmatmul.mubr.f32.vlgmr.msra.gmra.mrb[6].mxu0 %v899_v18  ;;  %2172 = vmatmul.mubr.f32.vlgmr.msra.gmra.mrb[14].mxu1 %v899_v18 }
 0x343   :  { %2584 = vmatpush1.bf16.msra.mxu0 %v3084_v15  ;;  %2615 = vmatpush3.bf16.msra.mxu1 %v3107_v33 }
 0x344   :  { %2586 = vmatprep.subr.bf16.mxu0 %v3087_v16  ;;  %2616 = vmatprep.subr.bf16.mxu1 %v2998_v40 }
 0x345   :  { %1134 = vmatprep.mubr.f32.mxu0 %v2997_v0  ;;  %2206 = vmatprep.mubr.msk.f32.mxu1 %vm2999_vm1, %v2997_v0 }
 0x347   :  { %2588 = vmatpush1.bf16.msra.mxu0 %v3101_v24  ;;  %2618 = vmatpush3.bf16.msra.mxu1 %v3123_v44 }
 0x348   :  { %2590 = vmatprep.subr.bf16.mxu0 %v3104_v26  ;;  %2619 = vmatprep.subr.bf16.mxu1 %v2998_v40 }
 0x34b   :  { %2592 = vmatpush1.bf16.msra.mxu0 %v3114_v35  ;;  %2621 = vmatpush3.bf16.msra.mxu1 %v3139_v54 }
 0x34c   :  { %2594 = vmatprep.subr.bf16.mxu0 %v3117_v37  ;;  %2622 = vmatprep.subr.bf16.mxu1 %v2998_v40 }
 0x34f   :  { %2596 = vmatpush1.bf16.msra.mxu0 %v3130_v46  ;;  %2624 = vmatpush3.bf16.msra.mxu1 %v3155_v1 }
 0x350   :  { %2598 = vmatprep.subr.bf16.mxu0 %v3133_v49  ;;  %2625 = vmatprep.subr.bf16.mxu1 %v2998_v40 }
 0x353   :  { %2600 = vmatpush1.bf16.msra.mxu0 %v3146_v56  ;;  %2627 = vmatpush3.bf16.msra.mxu1 %v3171_v11 }
 0x354   :  { %2602 = vmatprep.subr.bf16.mxu0 %v3149_v59  ;;  %2628 = vmatprep.subr.bf16.mxu1 %v2998_v40 }
 0x357   :  { %2604 = vmatpush1.bf16.msra.mxu0 %v3162_v3  ;;  %2630 = vmatpush3.bf16.msra.mxu1 %v3187_v22 }
 0x358   :  { %2606 = vmatprep.subr.bf16.mxu0 %v3165_v6  ;;  %2631 = vmatprep.subr.bf16.mxu1 %v2998_v40 }
 0x35b   :  { %2608 = vmatpush1.bf16.msra.mxu0 %v3178_v14  ;;  %2633 = vmatpush3.bf16.msra.mxu1 %v3201_v29 }
 0x35c   :  { %2610 = vmatprep.subr.bf16.mxu0 %v3181_v19  ;;  %2634 = vmatprep.subr.bf16.mxu1 %v2998_v40 }
 0x35f   :  { %2612 = vmatpush1.bf16.msra.mxu0 %v3194_v25  ;;  %2636 = vmatpush3.bf16.msra.mxu1 %v3212_v32 }
 0x360   :  { %2638 = vmatprep.subr.bf16.mxu0 %v3082_v12  ;;  %2669 = vmatprep.subr.bf16.mxu1 %v2998_v40 }
 0x415   :  { %v972_v51 = vpop.f32.mrb[6].mxu0  ;;  %v1043_v21 = vpop.f32.mrb[14].mxu1 }
 0x416   :  { %v2835_v23 = vadd.f32 %v972_v51, %v3266_v60  ;;  %v974_v27 = vpop.f32.mrb[7].mxu0  ;;  %v2173_v28 = vpop.f32.mrb[15].mxu1  ;;  %v1047_v38 = vadd.f32 %v3279_v20, %v1043_v21 }
 0x417   :  { %v2836_v31 = vadd.f32 %v974_v27, %v3273_v10 }
 0x418   :  { %v1049_v30 = vmul.f32 0.5, %v2835_v23 }
 0x419   :  { %v1054_v34 = vmul.f32 0.5, %v2836_v31 }
 0x41a   :  { %2889 = vtanh.f32 %v1049_v30 }
 0x41b   :  { %2891 = vtanh.f32 %v1054_v34 }
 0x424   :  { %v2890_v36 = vpop.eup %2889 }
 0x425   :  { %v1051_v43 = vmul.f32 0.5, %v2890_v36  ;;  %v2892_v50 = vpop.eup %2891 }
 0x426   :  { %v1056_v52 = vmul.f32 0.5, %v2892_v50 }
 0x427   :  { %v1052_v39 = vadd.f32 0.5, %v1051_v43 }
 0x428   :  { %v1057_v41 = vadd.f32 0.5, %v1056_v52 }
 0x429   :  { %v1058_v42 = vmul.f32 %v1052_v39, %v1047_v38 }
 0x42b   :  { %v1059_v47 = vadd.f32 %v1058_v42, %v3258_v48 }
 0x42d   :  { %2893 = vtanh.f32 %v1059_v47 }
 0x437   :  { %v2894_v55 = vpop.eup %2893 }
 0x438   :  { %v1061_v45 = vsub.f32 %v899_v18, %v2894_v55 }
 0x43a   :  { %v1062_v57 = vmul.f32 %v1061_v45, %v1057_v41 }
 0x43c   :  { %v1063_v61 = vadd.f32 %v2894_v55, %v1062_v57 }
 0x43e   :  { %1135 = vmatmul.mubr.f32.vlgmr.msra.gmra.mrb[8].mxu0 %v1063_v61  ;;  %2207 = vmatmul.mubr.f32.vlgmr.msra.gmra.mrb[16].mxu1 %v1063_v61 }
 0x43f   :  { %2640 = vmatpush1.bf16.msra.mxu0 %v3084_v15  ;;  %2671 = vmatpush3.bf16.msra.mxu1 %v3107_v33 }
 0x440   :  { %2642 = vmatprep.subr.bf16.mxu0 %v3087_v16  ;;  %2672 = vmatprep.subr.bf16.mxu1 %v2998_v40 }
 0x441   :  { %1298 = vmatprep.mubr.f32.mxu0 %v2997_v0  ;;  %2241 = vmatprep.mubr.msk.f32.mxu1 %vm2999_vm1, %v2997_v0 }
 0x443   :  { %2644 = vmatpush1.bf16.msra.mxu0 %v3101_v24  ;;  %2674 = vmatpush3.bf16.msra.mxu1 %v3123_v44 }
 0x444   :  { %2646 = vmatprep.subr.bf16.mxu0 %v3104_v26  ;;  %2675 = vmatprep.subr.bf16.mxu1 %v2998_v40 }
 0x447   :  { %2648 = vmatpush1.bf16.msra.mxu0 %v3114_v35  ;;  %2677 = vmatpush3.bf16.msra.mxu1 %v3139_v54 }
 0x448   :  { %2650 = vmatprep.subr.bf16.mxu0 %v3117_v37  ;;  %2678 = vmatprep.subr.bf16.mxu1 %v2998_v40 }
 0x44b   :  { %2652 = vmatpush1.bf16.msra.mxu0 %v3130_v46  ;;  %2680 = vmatpush3.bf16.msra.mxu1 %v3155_v1 }
 0x44c   :  { %2654 = vmatprep.subr.bf16.mxu0 %v3133_v49  ;;  %2681 = vmatprep.subr.bf16.mxu1 %v2998_v40 }
 0x44f   :  { %2656 = vmatpush1.bf16.msra.mxu0 %v3146_v56  ;;  %2683 = vmatpush3.bf16.msra.mxu1 %v3171_v11 }
 0x450   :  { %2658 = vmatprep.subr.bf16.mxu0 %v3149_v59  ;;  %2684 = vmatprep.subr.bf16.mxu1 %v2998_v40 }
 0x453   :  { %2660 = vmatpush1.bf16.msra.mxu0 %v3162_v3  ;;  %2686 = vmatpush3.bf16.msra.mxu1 %v3187_v22 }
 0x454   :  { %2662 = vmatprep.subr.bf16.mxu0 %v3165_v6  ;;  %2687 = vmatprep.subr.bf16.mxu1 %v2998_v40 }
 0x457   :  { %2664 = vmatpush1.bf16.msra.mxu0 %v3178_v14  ;;  %2689 = vmatpush3.bf16.msra.mxu1 %v3201_v29 }
 0x458   :  { %2666 = vmatprep.subr.bf16.mxu0 %v3181_v19  ;;  %2690 = vmatprep.subr.bf16.mxu1 %v2998_v40 }
 0x45b   :  { %2668 = vmatpush1.bf16.msra.mxu0 %v3194_v25  ;;  %2692 = vmatpush3.bf16.msra.mxu1 %v3212_v32 }
 0x45c   :  { %2694 = vmatprep.subr.bf16.mxu0 %v3082_v12  ;;  %2725 = vmatprep.subr.bf16.mxu1 %v2998_v40 }
 0x511   :  { %v1136_v48 = vpop.f32.mrb[8].mxu0  ;;  %v1207_v63 = vpop.f32.mrb[16].mxu1 }
 0x512   :  { %v2837_v2 = vadd.f32 %v1136_v48, %v3266_v60  ;;  %v1138_v5 = vpop.f32.mrb[9].mxu0  ;;  %v2208_v7 = vpop.f32.mrb[17].mxu1  ;;  %v1211_v51 = vadd.f32 %v3279_v20, %v1207_v63 }
 0x513   :  { %v2838_v9 = vadd.f32 %v1138_v5, %v3273_v10 }
 0x514   :  { %v1213_v8 = vmul.f32 0.5, %v2837_v2 }
 0x515   :  { %v1218_v13 = vmul.f32 0.5, %v2838_v9 }
 0x516   :  { %2895 = vtanh.f32 %v1213_v8 }
 0x517   :  { %2897 = vtanh.f32 %v1218_v13 }
 0x520   :  { %v2896_v17 = vpop.eup %2895 }
 0x521   :  { %v1215_v18 = vmul.f32 0.5, %v2896_v17  ;;  %v2898_v28 = vpop.eup %2897 }
 0x522   :  { %v1220_v30 = vmul.f32 0.5, %v2898_v28  ;;  %v1726_v28 = vld [vmem:[#allocation6 + $0x30] sm:$0xff] }
 0x523   :  { %v1216_v21 = vadd.f32 0.5, %v1215_v18  ;;  %v1723_v18 = vld [vmem:[#allocation6 + $0x18] sm:$0xff] }
 0x524   :  { %v1221_v34 = vadd.f32 0.5, %v1220_v30 }
 0x525   :  { %v1222_v23 = vmul.f32 %v1216_v21, %v1211_v51  ;;  %v1724_v21 = vld [vmem:[#allocation6 + $0x20] sm:$0xff] }
 0x527   :  { %v1223_v27 = vadd.f32 %v1222_v23, %v3264_v58  ;;  %v1725_v23 = vld [vmem:[#allocation6 + $0x28] sm:$0xff] }
 0x529   :  { %2899 = vtanh.f32 %v1223_v27  ;;  %v2812_v27 = vpack.c.bf16 %v1725_v23, %v1724_v21 }
 0x533   :  { %v2900_v31 = vpop.eup %2899 }
 0x534   :  { %v1225_v36 = vsub.f32 %v1063_v61, %v2900_v31 }
 0x536   :  { %v1226_v43 = vmul.f32 %v1225_v36, %v1221_v34  ;;  %v1729_v34 = vld [vmem:[#allocation6 + $0x48] sm:$0xff] }
 0x538   :  { %v1227_v38 = vadd.f32 %v2900_v31, %v1226_v43  ;;  %v1728_v31 = vld [vmem:[#allocation6 + $0x40] sm:$0xff]  ;;  %v1730_v43 = vld [vmem:[#allocation6 + $0x50] sm:$0xff] }
 0x539   :  { %v2818_v36 = vpack.c.bf16 %v1729_v34, %v1728_v31 }
 0x53a   :  { %1299 = vmatmul.mubr.f32.vlgmr.msra.gmra.mrb[10].mxu0 %v1227_v38  ;;  %2242 = vmatmul.mubr.f32.vlgmr.msra.gmra.mrb[18].mxu1 %v1227_v38 }
 0x53b   :  { %2696 = vmatpush1.bf16.msra.mxu0 %v3084_v15  ;;  %2727 = vmatpush3.bf16.msra.mxu1 %v3107_v33 }
 0x53c   :  { %2698 = vmatprep.subr.bf16.mxu0 %v3087_v16  ;;  %2728 = vmatprep.subr.bf16.mxu1 %v2998_v40 }
 0x53d   :  { %1462 = vmatprep.mubr.f32.mxu0 %v2997_v0  ;;  %2276 = vmatprep.mubr.msk.f32.mxu1 %vm2999_vm1, %v2997_v0 }
 0x53f   :  { %2700 = vmatpush1.bf16.msra.mxu0 %v3101_v24  ;;  %2730 = vmatpush3.bf16.msra.mxu1 %v3123_v44 }
 0x540   :  { %2702 = vmatprep.subr.bf16.mxu0 %v3104_v26  ;;  %2731 = vmatprep.subr.bf16.mxu1 %v2998_v40 }
 0x543   :  { %2704 = vmatpush1.bf16.msra.mxu0 %v3114_v35  ;;  %2733 = vmatpush3.bf16.msra.mxu1 %v3139_v54 }
 0x544   :  { %2706 = vmatprep.subr.bf16.mxu0 %v3117_v37  ;;  %2734 = vmatprep.subr.bf16.mxu1 %v2998_v40 }
 0x547   :  { %2708 = vmatpush1.bf16.msra.mxu0 %v3130_v46  ;;  %2736 = vmatpush3.bf16.msra.mxu1 %v3155_v1 }
 0x548   :  { %2710 = vmatprep.subr.bf16.mxu0 %v3133_v49  ;;  %2737 = vmatprep.subr.bf16.mxu1 %v2998_v40 }
 0x54b   :  { %2712 = vmatpush1.bf16.msra.mxu0 %v3146_v56  ;;  %2739 = vmatpush3.bf16.msra.mxu1 %v3171_v11 }
 0x54c   :  { %2714 = vmatprep.subr.bf16.mxu0 %v3149_v59  ;;  %2740 = vmatprep.subr.bf16.mxu1 %v2998_v40 }
 0x54f   :  { %2716 = vmatpush1.bf16.msra.mxu0 %v3162_v3  ;;  %2742 = vmatpush3.bf16.msra.mxu1 %v3187_v22 }
 0x550   :  { %2718 = vmatprep.subr.bf16.mxu0 %v3165_v6  ;;  %2743 = vmatprep.subr.bf16.mxu1 %v2998_v40 }
 0x553   :  { %2720 = vmatpush1.bf16.msra.mxu0 %v3178_v14  ;;  %2745 = vmatpush3.bf16.msra.mxu1 %v3201_v29 }
 0x554   :  { %2722 = vmatprep.subr.bf16.mxu0 %v3181_v19  ;;  %2746 = vmatprep.subr.bf16.mxu1 %v2998_v40 }
 0x557   :  { %2724 = vmatpush1.bf16.msra.mxu0 %v3194_v25  ;;  %2748 = vmatpush3.bf16.msra.mxu1 %v3212_v32 }
 0x558   :  { %2750 = vmatprep.subr.bf16.mxu0 %v3082_v12  ;;  %2781 = vmatprep.subr.bf16.mxu1 %v2998_v40 }
 0x60d   :  { %v1300_v58 = vpop.f32.mrb[10].mxu0  ;;  %v1371_v39 = vpop.f32.mrb[18].mxu1 }
 0x60e   :  { %v2839_v42 = vadd.f32 %v1300_v58, %v3266_v60  ;;  %v1302_v47 = vpop.f32.mrb[11].mxu0  ;;  %v2243_v50 = vpop.f32.mrb[19].mxu1  ;;  %v1375_v61 = vadd.f32 %v3279_v20, %v1371_v39  ;;  %v1732_v39 = vld [vmem:[#allocation6 + $0x60] sm:$0xff] }
 0x60f   :  { %v2840_v55 = vadd.f32 %v1302_v47, %v3273_v10  ;;  %v1734_v50 = vld [vmem:[#allocation6 + $0x70] sm:$0xff] }
 0x610   :  { %v1377_v52 = vmul.f32 0.5, %v2839_v42  ;;  %v1733_v42 = vld [vmem:[#allocation6 + $0x68] sm:$0xff] }
 0x611   :  { %v1382_v41 = vmul.f32 0.5, %v2840_v55  ;;  %v2824_v47 = vpack.c.bf16 %v1733_v42, %v1732_v39 }
 0x612   :  { %2901 = vtanh.f32 %v1377_v52  ;;  %v1735_v52 = vld [vmem:[#allocation6 + $0x78] sm:$0xff] }
 0x613   :  { %2903 = vtanh.f32 %v1382_v41  ;;  %v2827_v55 = vpack.c.bf16 %v1735_v52, %v1734_v50 }
 0x61c   :  { %v2902_v45 = vpop.eup %2901 }
 0x61d   :  { %v1379_v57 = vmul.f32 0.5, %v2902_v45  ;;  %v2904_v2 = vpop.eup %2903 }
 0x61e   :  { %v1384_v5 = vmul.f32 0.5, %v2904_v2 }
 0x61f   :  { %v1380_v48 = vadd.f32 0.5, %v1379_v57 }
 0x620   :  { %v1385_v8 = vadd.f32 0.5, %v1384_v5 }
 0x621   :  { %v1386_v12 = vmul.f32 %v1380_v48, %v1375_v61 }
 0x623   :  { %v1387_v63 = vadd.f32 %v1386_v12, %v3262_v53 }
 0x625   :  { %2905 = vtanh.f32 %v1387_v63 }
 0x62f   :  { %v2906_v7 = vpop.eup %2905 }
 0x630   :  { %v1389_v9 = vsub.f32 %v1227_v38, %v2906_v7  ;;  %v1731_v38 = vld [vmem:[#allocation6 + $0x58] sm:$0xff] }
 0x631   :  { %v2821_v58 = vpack.c.bf16 %v1731_v38, %v1730_v43 }
 0x632   :  { %v1390_v13 = vmul.f32 %v1389_v9, %v1385_v8 }
 0x634   :  { %v1391_v17 = vadd.f32 %v2906_v7, %v1390_v13 }
 0x636   :  { %1463 = vmatmul.mubr.f32.vlgmr.msra.gmra.mrb[12].mxu0 %v1391_v17  ;;  %2277 = vmatmul.mubr.f32.vlgmr.msra.gmra.mrb[20].mxu1 %v1391_v17 }
 0x637   :  { %2752 = vmatpush1.bf16.msra.mxu0 %v3084_v15  ;;  %2783 = vmatpush3.bf16.msra.mxu1 %v3107_v33 }
 0x638   :  { %2754 = vmatprep.subr.bf16.mxu0 %v3087_v16  ;;  %2784 = vmatprep.subr.bf16.mxu1 %v2998_v40 }
 0x639   :  { %1626 = vmatprep.mubr.f32.mxu0 %v2997_v0  ;;  %2311 = vmatprep.mubr.msk.f32.mxu1 %vm2999_vm1, %v2997_v0 }
 0x63b   :  { %2756 = vmatpush1.bf16.msra.mxu0 %v3101_v24  ;;  %2786 = vmatpush3.bf16.msra.mxu1 %v3123_v44 }
 0x63c   :  { %2758 = vmatprep.subr.bf16.mxu0 %v3104_v26  ;;  %2787 = vmatprep.subr.bf16.mxu1 %v2998_v40 }
 0x63f   :  { %2760 = vmatpush1.bf16.msra.mxu0 %v3114_v35  ;;  %2789 = vmatpush3.bf16.msra.mxu1 %v3139_v54 }
 0x640   :  { %2762 = vmatprep.subr.bf16.mxu0 %v3117_v37  ;;  %2790 = vmatprep.subr.bf16.mxu1 %v2998_v40 }
 0x643   :  { %2764 = vmatpush1.bf16.msra.mxu0 %v3130_v46  ;;  %2792 = vmatpush3.bf16.msra.mxu1 %v3155_v1 }
 0x644   :  { %2766 = vmatprep.subr.bf16.mxu0 %v3133_v49  ;;  %2793 = vmatprep.subr.bf16.mxu1 %v2998_v40 }
 0x647   :  { %2768 = vmatpush1.bf16.msra.mxu0 %v3146_v56  ;;  %2795 = vmatpush3.bf16.msra.mxu1 %v3171_v11 }
 0x648   :  { %2770 = vmatprep.subr.bf16.mxu0 %v3149_v59  ;;  %2796 = vmatprep.subr.bf16.mxu1 %v2998_v40 }
 0x64b   :  { %2772 = vmatpush1.bf16.msra.mxu0 %v3162_v3  ;;  %2798 = vmatpush3.bf16.msra.mxu1 %v3187_v22 }
 0x64c   :  { %2774 = vmatprep.subr.bf16.mxu0 %v3165_v6  ;;  %2799 = vmatprep.subr.bf16.mxu1 %v2998_v40 }
 0x64f   :  { %2776 = vmatpush1.bf16.msra.mxu0 %v3178_v14  ;;  %2801 = vmatpush3.bf16.msra.mxu1 %v3201_v29  ;;  %v1720_v29 = vld [vmem:[#allocation6] sm:$0xff] }
 0x650   :  { %2778 = vmatprep.subr.bf16.mxu0 %v3181_v19  ;;  %2802 = vmatprep.subr.bf16.mxu1 %v2998_v40 }
 0x653   :  { %2780 = vmatpush1.bf16.msra.mxu0 %v3194_v25  ;;  %2804 = vmatpush3.bf16.msra.mxu1 %v3212_v32  ;;  %v1721_v32 = vld [vmem:[#allocation6 + $0x8] sm:$0xff] }
 0x654   :  { %2805 = vmatprep.subr.bf16.mxu0 %v2998_v40  ;;  %v2806_v53 = vpack.c.bf16 %v1721_v32, %v1720_v29 }
 0x709   :  { %v1464_v15 = vpop.f32.mrb[12].mxu0  ;;  %v1535_v16 = vpop.f32.mrb[20].mxu1 }
 0x70a   :  { %v2841_v24 = vadd.f32 %v1464_v15, %v3266_v60  ;;  %v1466_v26 = vpop.f32.mrb[13].mxu0  ;;  %v2278_v33 = vpop.f32.mrb[21].mxu1  ;;  %v1539_v54 = vadd.f32 %v3279_v20, %v1535_v16 }
 0x70b   :  { %v2842_v37 = vadd.f32 %v1466_v26, %v3273_v10 }
 0x70c   :  { %v1541_v35 = vmul.f32 0.5, %v2841_v24 }
 0x70d   :  { %v1546_v44 = vmul.f32 0.5, %v2842_v37 }
 0x70e   :  { %2907 = vtanh.f32 %v1541_v35 }
 0x70f   :  { %2909 = vtanh.f32 %v1546_v44 }
 0x718   :  { %v2908_v46 = vpop.eup %2907 }
 0x719   :  { %v1543_v49 = vmul.f32 0.5, %v2908_v46  ;;  %v2910_v3 = vpop.eup %2909 }
 0x71a   :  { %v1548_v6 = vmul.f32 0.5, %v2910_v3 }
 0x71b   :  { %v1544_v56 = vadd.f32 0.5, %v1543_v49 }
 0x71c   :  { %v1549_v14 = vadd.f32 0.5, %v1548_v6 }
 0x71d   :  { %v1550_v59 = vmul.f32 %v1544_v56, %v1539_v54 }
 0x71f   :  { %v1551_v1 = vadd.f32 %v1550_v59, %v3270_v4  ;;  %v1722_v4 = vld [vmem:[#allocation6 + $0x10] sm:$0xff] }
 0x720   :  { %v2809_v51 = vpack.c.bf16 %v1723_v18, %v1722_v4 }
 0x721   :  { %2911 = vtanh.f32 %v1551_v1 }
 0x72b   :  { %v2912_v11 = vpop.eup %2911 }
 0x72c   :  { %v1553_v19 = vsub.f32 %v1391_v17, %v2912_v11 }
 0x72e   :  { %v1554_v22 = vmul.f32 %v1553_v19, %v1549_v14 }
 0x730   :  { %v3515_v25 = vadd.f32 %v2912_v11, %v1554_v22 }
 0x732   :  { %1627 = vmatmul.mubr.f32.vlgmr.msra.gmra.mrb[14].mxu0 %v3515_v25  ;;  %2312 = vmatmul.mubr.f32.vlgmr.msra.gmra.mrb[22].mxu1 %v3515_v25 }
 0x733   :  { %2346 = vmatprep.mubr.msk.f32.mxu0 %vm2999_vm1, %v2997_v0  ;;  %2807 = vmatpush3.bf16.msra.mxu0 %v2806_v53  ;;  %v1727_v0 = vld [vmem:[#allocation6 + $0x38] sm:$0xff] }
 0x734   :  { %2808 = vmatprep.subr.bf16.mxu0 %v2998_v40  ;;  %v2815_v30 = vpack.c.bf16 %v1727_v0, %v1726_v28 }
 0x737   :  { %2810 = vmatpush3.bf16.msra.mxu0 %v2809_v51 }
 0x738   :  { %2811 = vmatprep.subr.bf16.mxu0 %v2998_v40 }
 0x73b   :  { %2813 = vmatpush3.bf16.msra.mxu0 %v2812_v27 }
 0x73c   :  { %2814 = vmatprep.subr.bf16.mxu0 %v2998_v40 }
 0x73f   :  { %2816 = vmatpush3.bf16.msra.mxu0 %v2815_v30 }
 0x740   :  { %2817 = vmatprep.subr.bf16.mxu0 %v2998_v40 }
 0x743   :  { %2819 = vmatpush3.bf16.msra.mxu0 %v2818_v36 }
 0x744   :  { %2820 = vmatprep.subr.bf16.mxu0 %v2998_v40 }
 0x747   :  { %2822 = vmatpush3.bf16.msra.mxu0 %v2821_v58 }
 0x748   :  { %2823 = vmatprep.subr.bf16.mxu0 %v2998_v40 }
 0x74b   :  { %2825 = vmatpush3.bf16.msra.mxu0 %v2824_v47 }
 0x74c   :  { %2826 = vmatprep.subr.bf16.mxu0 %v2998_v40 }
 0x74f   :  { %2828 = vmatpush3.bf16.msra.mxu0 %v2827_v55 }
 0x805   :  { %v1628_v41 = vpop.f32.mrb[14].mxu0  ;;  %v1699_v45 = vpop.f32.mrb[22].mxu1 }
 0x806   :  { %v2843_v57 = vadd.f32 %v1628_v41, %v3266_v60  ;;  %v1630_v61 = vpop.f32.mrb[15].mxu0  ;;  %v2313_v48 = vpop.f32.mrb[23].mxu1  ;;  %v1703_v8 = vadd.f32 %v3279_v20, %v1699_v45 }
 0x807   :  { %v2844_v63 = vadd.f32 %v1630_v61, %v3273_v10  ;;  %v1854_v10 = vld [vmem:[%s3554_s6] ss:$0 sm:$0xff] }
 0x808   :  { %v1705_v12 = vmul.f32 0.5, %v2843_v57 }
 0x809   :  { %v1710_v2 = vmul.f32 0.5, %v2844_v63 }
 0x80a   :  { %2913 = vtanh.f32 %v1705_v12 }
 0x80b   :  { %2915 = vtanh.f32 %v1710_v2 }
 0x814   :  { %v2914_v5 = vpop.eup %2913 }
 0x815   :  { %v1707_v7 = vmul.f32 0.5, %v2914_v5  ;;  %v2916_v17 = vpop.eup %2915 }
 0x816   :  { %v1712_v15 = vmul.f32 0.5, %v2916_v17 }
 0x817   :  { %v1708_v40 = vadd.f32 0.5, %v1707_v7 }
 0x818   :  { %v1713_v16 = vadd.f32 0.5, %v1712_v15 }
 0x819   :  { %v1714_v9 = vmul.f32 %v1708_v40, %v1703_v8 }
 0x81b   :  { %v1715_v13 = vadd.f32 %v1714_v9, %v3268_v62 }
 0x81d   :  { %2917 = vtanh.f32 %v1715_v13 }
 0x827   :  { %v2918_v60 = vpop.eup %2917 }
 0x828   :  { %v1717_v24 = vsub.f32 %v3515_v25, %v2918_v60 }
 0x82a   :  { %v1718_v26 = vmul.f32 %v1717_v24, %v1713_v16 }
 0x82c   :  { %v1719_v33 = vadd.f32 %v2918_v60, %v1718_v26 }
 0x82e   :  { %2347 = vmatmul.mubr.f32.vlgmr.msra.gmra.mrb[16].mxu0 %v1719_v33 }
 0x901   :  { %v1809_v20 = vpop.f32.mrb[16].mxu0 }
 0x902   :  { %v1810_v35 = vadd.f32 %v1854_v10, %v1809_v20  ;;  %v2348_v37 = vpop.f32.mrb[17].mxu0 }
 0x904   :  { %1813 = vst [vmem:[#allocation8] sm:$0xff] %v1810_v35 }
 0x905   :  { %2974 = shalt.err (!%p2971_p6)
}
 0x906   :  { %s2975_s14 = scalar_lea.hbm %s3555_s7, 128 }
 0x907   :  { %p2976_p7 = scmp.ne.s32.totalorder %s3555_s7, %s2975_s14  ;;  %p2979_p8 = scmp.lt.u32.totalorder %s2975_s14, %s3555_s7 }
 0x909   :  { %p2981_p9 = pnand %p2979_p8, %p2976_p7 }
 0x90b   :  { %2984 = shalt.err (!%p2981_p9)
}
 0x90c   :  { %1823 = dma.vmem_to_hbm [thread:$0]  %s1821_s5, 128, %s3555_s7, [#allocation5]  }
 0x90d   :  { %2989 = dma.done.wait [#allocation5], 128  }
 0x90e   :  { %2990 = vsyncadd [#allocation5], 4294967168 }
 0x90f   :  { %1827 = vsyncpa [#allocation4], 1 }
 0x910   :  { %1828 = vsyncpa [#allocation7], 1 }
 0x911   :  { %1829 = vsyncpa [#allocation5], 1 }

</bundles_post_ra>
